<compile_context>
chip_gen: v7x
topology: tpu7x:2x2x1
jax: 0.10.0
libtpu: 0.0.40
codegen_flags: <defaults>
</compile_context>

<pallas_src>
import functools

import jax
import jax.numpy as jnp
from jax.experimental import pallas as pl
from jax.experimental.pallas import tpu as pltpu


MATMUL_DTYPE = jnp.bfloat16   # MXU-native input dtype; accumulation stays f32
LANE = 128


def _lane_pad(c):
    return ((c + LANE - 1) // LANE) * LANE


# ----------------------------- Pallas kernel ------------------------------- #

def _rgcn_fused_kernel(*refs, meta):
    """Fused multi-layer RGCN forward + log_softmax (single block, no grid).

    refs: [x_ref, (a_ref, w_ref, mask_ref, bias_ref) per layer ..., out_ref]

      a_ref    : (E*Nt, Ns)    bf16  unnormalized 0/1(+) edge counts, e-major
      w_ref    : (E+T, Cp, Cp) bf16  [wrel_0..wrel_{E-1}, wroot_0..wroot_{T-1}]
      mask_ref : (T, Nt, Cp)   bf16  one-hot node-type masks, lane-broadcast
      bias_ref : (Nt, Cp)      f32   pre-selected root bias (one_hot @ b_root)

    meta: ((n_tgt, cout_real, num_edge_types, num_node_types, apply_relu), ...)
    """
    out_ref = refs[-1]
    x = refs[0][...]                                       # (Ns0, Cp) bf16
    ptr = 1
    acc = None
    cout_last = meta[-1][1]

    for (n_tgt, cout_real, num_e, num_t, apply_relu) in meta:
        a_ref, w_ref, mask_ref, bias_ref = refs[ptr:ptr + 4]
        ptr += 4

        # ---- relational (scatter-mean message) path ---------------------- #
        a = a_ref[...]                                               # bf16 counts
        deg = jnp.sum(a.astype(jnp.float32), axis=-1, keepdims=True)  # (E*Nt,1) f32
        inv_deg = 1.0 / jnp.maximum(deg, 1.0)
        y = jnp.dot(a, x, preferred_element_type=jnp.float32)        # (E*Nt,Cp) f32
        y = (y * inv_deg).astype(MATMUL_DTYPE)   # f32 scale on VPU, cast bf16 once

        acc = bias_ref[...]                                          # (Nt,Cp) f32
        for e in range(num_e):
            acc = acc + jnp.dot(y[e * n_tgt:(e + 1) * n_tgt, :], w_ref[e],
                                preferred_element_type=jnp.float32)

        # ---- root (self) path: out[type==t] += root_lins[t](x_target) ---- #
        xt = x[:n_tgt, :]                                            # bf16
        for t in range(num_t):
            acc = acc + jnp.dot(mask_ref[t] * xt, w_ref[num_e + t],
                                preferred_element_type=jnp.float32)

        if apply_relu:
            acc = jnp.maximum(acc, 0.0)
            # TODO(synk): F.dropout between layers applied as identity
            # (eval-mode semantics); training-mode dropout would use
            # pltpu.prng_seed / pltpu.prng_random_bits in-kernel.
            x = acc.astype(MATMUL_DTYPE)

    # log_softmax over the real output columns only (padded lanes masked out).
    lane_idx = jax.lax.broadcasted_iota(jnp.int32, acc.shape, 1)
    acc = jnp.where(lane_idx < cout_last, acc, -1e30)
    m = jnp.max(acc, axis=-1, keepdims=True)
    s = acc - m
    lse = jnp.log(jnp.sum(jnp.exp(s), axis=-1, keepdims=True))
    out_ref[...] = (s - lse).astype(out_ref.dtype)


# ------------------------------ pallas_call wrapper ------------------------ #

def rgcn_fused(x0, layer_inputs, layer_meta):
    """Single, grid-less, VMEM-resident pallas_call running every layer."""
    args = [x0]
    for li in layer_inputs:
        args.extend(li)
    n_out = layer_meta[-1][0]
    cp_out = _lane_pad(layer_meta[-1][1])
    kernel = functools.partial(_rgcn_fused_kernel, meta=tuple(layer_meta))
    return pl.pallas_call(
        kernel,
        out_shape=jax.ShapeDtypeStruct((n_out, cp_out), jnp.float32),
        in_specs=[pl.BlockSpec(memory_space=pltpu.MemorySpace.VMEM)
                  for _ in args],
        out_specs=pl.BlockSpec(memory_space=pltpu.MemorySpace.VMEM),
    )(*args)


# ------------------------------ JAX glue ----------------------------------- #

def group_input(x_all_dict, node_type, local_node_idx, n_id, in_channels):
    nt = node_type[n_id]
    li = local_node_idx[n_id]
    h = jnp.zeros((n_id.shape[0], in_channels), jnp.float32)
    for key, src in x_all_dict.items():
        mask = (nt == key)
        gathered = src[jnp.clip(li, 0, src.shape[0] - 1)]
        h = jnp.where(mask[:, None], gathered, h)
    return h, nt


def _edge_counts(edge_index, etypes, num_edge_types, n_tgt, n_src):
    """Dense per-edge-type 0/1(+) counts (E, Nt, Ns); normalization is done
    in f32 inside the kernel (PyG scatter-mean semantics)."""
    src, dst = edge_index[0], edge_index[1]
    A = jnp.zeros((num_edge_types, n_tgt, n_src), jnp.float32)
    return A.at[etypes, dst, src].add(1.0)


def _prepare_layers(params, n_id, x_dict, emb_dict, adjs, edge_type, node_type,
                    local_node_idx, *, in_channels, num_edge_types,
                    num_node_types, num_layers):
    x_all = {**x_dict, **emb_dict}
    x, ntypes = group_input(x_all, node_type, local_node_idx, n_id, in_channels)

    cp_in0 = _lane_pad(in_channels)
    x0 = jnp.pad(x, ((0, 0), (0, cp_in0 - in_channels))).astype(MATMUL_DTYPE)

    layer_inputs, layer_meta = [], []
    for i, (edge_index, e_id, size) in enumerate(adjs):
        n_src, n_tgt = size
        ntypes = ntypes[:n_tgt]
        et = edge_type[e_id]

        A = _edge_counts(edge_index, et, num_edge_types, n_tgt, n_src)
        a_cnt = A.reshape(num_edge_types * n_tgt, n_src).astype(MATMUL_DTYPE)

        w_rel, w_root, b_root = params[i]   # (E,Cin,Cout), (T,Cin,Cout), (T,Cout)
        E, cin, cout = w_rel.shape
        T = w_root.shape[0]
        cp_in, cp_out = _lane_pad(cin), _lane_pad(cout)

        # one lane-dense bf16 weight slab: rel weights then root weights
        w_all = jnp.concatenate([w_rel, w_root], axis=0)           # (E+T,Cin,Cout)
        w_all = jnp.pad(w_all, ((0, 0), (0, cp_in - cin), (0, cp_out - cout)))
        w_all = w_all.astype(MATMUL_DTYPE)

        mask_onehot = jax.nn.one_hot(ntypes, T, dtype=jnp.float32)  # (Nt,T)
        mask_b = jnp.broadcast_to(mask_onehot.T[:, :, None],
                                  (T, n_tgt, cp_in)).astype(MATMUL_DTYPE)

        bias_sel = mask_onehot @ b_root                             # (Nt,Cout) f32
        bias_sel = jnp.pad(bias_sel, ((0, 0), (0, cp_out - cout)))

        layer_inputs.append((a_cnt, w_all, mask_b, bias_sel))
        layer_meta.append((n_tgt, cout, E, T, i != num_layers - 1))
    return x0, layer_inputs, layer_meta


def rgcn_forward(params, n_id, x_dict, emb_dict, adjs, edge_type, node_type,
                 local_node_idx, *, in_channels, num_edge_types,
                 num_node_types, num_layers):
    x0, layer_inputs, layer_meta = _prepare_layers(
        params, n_id, x_dict, emb_dict, adjs, edge_type, node_type,
        local_node_idx, in_channels=in_channels, num_edge_types=num_edge_types,
        num_node_types=num_node_types, num_layers=num_layers)
    out_channels = layer_meta[-1][1]
    out_padded = rgcn_fused(x0, layer_inputs, layer_meta)
    return out_padded[:, :out_channels]


def rgcn_reference(params, n_id, x_dict, emb_dict, adjs, edge_type, node_type,
                   local_node_idx, *, in_channels, num_edge_types,
                   num_node_types, num_layers):
    """Plain-jnp forward mirroring the kernel's bf16-input / f32-accumulate
    math (counts matmul, f32 1/deg scale, f32 bias, masked root matmuls)."""
    def r(v):  # emulate the bf16 rounding applied to MXU inputs
        return v.astype(jnp.bfloat16).astype(jnp.float32)
    hi = jax.lax.Precision.HIGHEST

    x_all = {**x_dict, **emb_dict}
    x, ntypes = group_input(x_all, node_type, local_node_idx, n_id, in_channels)
    out = None
    for i, (edge_index, e_id, size) in enumerate(adjs):
        n_src, n_tgt = size
        ntypes = ntypes[:n_tgt]
        et = edge_type[e_id]
        A = _edge_counts(edge_index, et, num_edge_types, n_tgt, n_src)
        w_rel, w_root, b_root = params[i]
        xt = x[:n_tgt]
        out = jax.nn.one_hot(ntypes, num_node_types, dtype=jnp.float32) @ b_root
        for e in range(num_edge_types):
            y = jnp.dot(r(A[e]), r(x), precision=hi)
            inv = 1.0 / jnp.maximum(jnp.sum(A[e], axis=-1, keepdims=True), 1.0)
            out = out + jnp.dot(r(y * inv), r(w_rel[e]), precision=hi)
        for t in range(num_node_types):
            m = (ntypes == t).astype(jnp.float32)[:, None]
            out = out + jnp.dot(m * r(xt), r(w_root[t]), precision=hi)
        if i != num_layers - 1:
            out = jnp.maximum(out, 0.0)
            x = out
    return jax.nn.log_softmax(out, axis=-1)


# ------------------------------ main ---------------------------------------- #

if __name__ == "__main__":
    in_channels, hidden_channels, out_channels = 32, 32, 16
    num_layers = 2
    num_node_types = 3        # node type 0 has features, 1 & 2 use embeddings
    num_edge_types = 3
    total_nodes = 100         # 40 of type 0, 30 of type 1, 30 of type 2

    key = jax.random.PRNGKey(0)
    keys = jax.random.split(key, 16)

    x_dict = {0: jax.random.normal(keys[0], (40, in_channels), jnp.float32)}
    emb_dict = {1: jax.random.normal(keys[1], (30, in_channels), jnp.float32),
                2: jax.random.normal(keys[2], (30, in_channels), jnp.float32)}

    node_type = jnp.concatenate([
        jnp.zeros((40,), jnp.int32),
        jnp.ones((30,), jnp.int32),
        jnp.full((30,), 2, jnp.int32)])
    local_node_idx = jnp.concatenate([
        jnp.arange(40, dtype=jnp.int32),
        jnp.arange(30, dtype=jnp.int32),
        jnp.arange(30, dtype=jnp.int32)])

    # sampled subgraph: 64 nodes; first 32 are layer-1 targets, first 16 layer-2
    n_id = jax.random.permutation(keys[3], total_nodes)[:64].astype(jnp.int32)

    E_global = 200
    edge_type = jax.random.randint(keys[4], (E_global,), 0,
                                   num_edge_types).astype(jnp.int32)

    e1 = 120
    ei1 = jnp.stack([jax.random.randint(keys[5], (e1,), 0, 64),
                     jax.random.randint(keys[6], (e1,), 0, 32)]).astype(jnp.int32)
    e_id1 = jnp.arange(0, e1, dtype=jnp.int32)

    e2 = 60
    ei2 = jnp.stack([jax.random.randint(keys[7], (e2,), 0, 32),
                     jax.random.randint(keys[8], (e2,), 0, 16)]).astype(jnp.int32)
    e_id2 = jnp.arange(e1, e1 + e2, dtype=jnp.int32)

    adjs = [(ei1, e_id1, (64, 32)), (ei2, e_id2, (32, 16))]

    # deterministic parameter init (uniform +-1/sqrt(fan_in), like nn.Linear)
    def init_conv(k, ic, oc):
        ks = jax.random.split(k, num_edge_types + num_node_types)
        bound = 1.0 / (ic ** 0.5)
        w_rel = jnp.stack([
            jax.random.uniform(ks[e], (ic, oc), jnp.float32, -bound, bound)
            for e in range(num_edge_types)])
        w_root, b_root = [], []
        for t in range(num_node_types):
            kw, kb = jax.random.split(ks[num_edge_types + t])
            w_root.append(jax.random.uniform(kw, (ic, oc), jnp.float32,
                                             -bound, bound))
            b_root.append(jax.random.uniform(kb, (oc,), jnp.float32,
                                             -bound, bound))
        return w_rel, jnp.stack(w_root), jnp.stack(b_root)

    params = [init_conv(keys[9], in_channels, hidden_channels),
              init_conv(keys[10], hidden_channels, out_channels)]

    common = dict(in_channels=in_channels, num_edge_types=num_edge_types,
                  num_node_types=num_node_types, num_layers=num_layers)

    out = rgcn_forward(params, n_id, x_dict, emb_dict, adjs, edge_type,
                       node_type, local_node_idx, **common)
    jax.block_until_ready(out)

    assert out.shape == (16, out_channels)
    assert bool(jnp.all(jnp.isfinite(out)))
    # log_softmax rows must exponentiate-sum to 1
    assert bool(jnp.allclose(jnp.sum(jnp.exp(out), axis=-1), 1.0, atol=1e-3))
    # compare against a plain-jnp reference with matching input rounding
    ref = rgcn_reference(params, n_id, x_dict, emb_dict, adjs, edge_type,
                         node_type, local_node_idx, **common)
    assert bool(jnp.allclose(out, ref, atol=1e-2, rtol=1e-2))
    print("KERNEL_OK")
</pallas_src>

<mosaic_0001>
module attributes {stable_mosaic.version = 11 : i64} {
  func.func @_rgcn_fused_kernel(%arg0: memref<64x128xbf16, #tpu.memory_space<vmem>>, %arg1: memref<96x64xbf16, #tpu.memory_space<vmem>>, %arg2: memref<6x128x128xbf16, #tpu.memory_space<vmem>>, %arg3: memref<3x32x128xbf16, #tpu.memory_space<vmem>>, %arg4: memref<32x128xf32, #tpu.memory_space<vmem>>, %arg5: memref<48x32xbf16, #tpu.memory_space<vmem>>, %arg6: memref<6x128x128xbf16, #tpu.memory_space<vmem>>, %arg7: memref<3x16x128xbf16, #tpu.memory_space<vmem>>, %arg8: memref<16x128xf32, #tpu.memory_space<vmem>>, %arg9: memref<16x128xf32, #tpu.memory_space<vmem>>) attributes {dimension_semantics = [], scalar_prefetch = 0 : i64, scratch_operands = 0 : i64, tpu.core_type = #tpu.core_type<tc>} {
    %c0 = arith.constant 0 : index
    %c0_0 = arith.constant 0 : index
    %0 = vector.load %arg0[%c0, %c0_0] : memref<64x128xbf16, #tpu.memory_space<vmem>>, vector<64x128xbf16>
    %c0_1 = arith.constant 0 : index
    %c0_2 = arith.constant 0 : index
    %1 = vector.load %arg1[%c0_1, %c0_2] : memref<96x64xbf16, #tpu.memory_space<vmem>>, vector<96x64xbf16>
    %2 = arith.extf %1 : vector<96x64xbf16> to vector<96x64xf32>
    %cst = arith.constant dense<0.000000e+00> : vector<96xf32>
    %3 = vector.multi_reduction <add>, %2, %cst [1] : vector<96x64xf32> to vector<96xf32>
    %4 = vector.shape_cast %3 : vector<96xf32> to vector<96x1xf32>
    %cst_3 = arith.constant 1.000000e+00 : f32
    %5 = vector.broadcast %cst_3 : f32 to vector<96x1xf32>
    %6 = arith.maximumf %4, %5 : vector<96x1xf32>
    %cst_4 = arith.constant 1.000000e+00 : f32
    %7 = vector.broadcast %cst_4 : f32 to vector<96x1xf32>
    %8 = arith.divf %7, %6 : vector<96x1xf32>
    %cst_5 = arith.constant dense<0.000000e+00> : vector<96x128xf32>
    %9 = tpu.matmul %1, %0, %cst_5 {dimension_numbers = #tpu.dot_dimension_numbers<[1], [0], [0], [1], [0, 0, 1, 1], [], []>} : vector<96x64xbf16>, vector<64x128xbf16>, vector<96x128xf32> -> vector<96x128xf32>
    %10 = vector.broadcast %8 : vector<96x1xf32> to vector<96x128xf32>
    %11 = arith.mulf %9, %10 : vector<96x128xf32>
    %12 = arith.truncf %11 : vector<96x128xf32> to vector<96x128xbf16>
    %c0_6 = arith.constant 0 : index
    %c0_7 = arith.constant 0 : index
    %13 = vector.load %arg4[%c0_6, %c0_7] : memref<32x128xf32, #tpu.memory_space<vmem>>, vector<32x128xf32>
    %14 = vector.extract_strided_slice %12 {offsets = [0, 0], sizes = [32, 128], strides = [1, 1]} : vector<96x128xbf16> to vector<32x128xbf16>
    %c0_8 = arith.constant 0 : index
    %c0_9 = arith.constant 0 : index
    %c0_10 = arith.constant 0 : index
    %15 = vector.load %arg2[%c0_8, %c0_9, %c0_10] : memref<6x128x128xbf16, #tpu.memory_space<vmem>>, vector<1x128x128xbf16>
    %16 = vector.shape_cast %15 : vector<1x128x128xbf16> to vector<128x128xbf16>
    %cst_11 = arith.constant dense<0.000000e+00> : vector<32x128xf32>
    %17 = tpu.matmul %14, %16, %cst_11 {dimension_numbers = #tpu.dot_dimension_numbers<[1], [0], [0], [1], [0, 0, 1, 1], [], []>} : vector<32x128xbf16>, vector<128x128xbf16>, vector<32x128xf32> -> vector<32x128xf32>
    %18 = arith.addf %13, %17 : vector<32x128xf32>
    %19 = vector.extract_strided_slice %12 {offsets = [32, 0], sizes = [32, 128], strides = [1, 1]} : vector<96x128xbf16> to vector<32x128xbf16>
    %c1 = arith.constant 1 : index
    %c0_12 = arith.constant 0 : index
    %c0_13 = arith.constant 0 : index
    %20 = vector.load %arg2[%c1, %c0_12, %c0_13] : memref<6x128x128xbf16, #tpu.memory_space<vmem>>, vector<1x128x128xbf16>
    %21 = vector.shape_cast %20 : vector<1x128x128xbf16> to vector<128x128xbf16>
    %cst_14 = arith.constant dense<0.000000e+00> : vector<32x128xf32>
    %22 = tpu.matmul %19, %21, %cst_14 {dimension_numbers = #tpu.dot_dimension_numbers<[1], [0], [0], [1], [0, 0, 1, 1], [], []>} : vector<32x128xbf16>, vector<128x128xbf16>, vector<32x128xf32> -> vector<32x128xf32>
    %23 = arith.addf %18, %22 : vector<32x128xf32>
    %24 = vector.extract_strided_slice %12 {offsets = [64, 0], sizes = [32, 128], strides = [1, 1]} : vector<96x128xbf16> to vector<32x128xbf16>
    %c2 = arith.constant 2 : index
    %c0_15 = arith.constant 0 : index
    %c0_16 = arith.constant 0 : index
    %25 = vector.load %arg2[%c2, %c0_15, %c0_16] : memref<6x128x128xbf16, #tpu.memory_space<vmem>>, vector<1x128x128xbf16>
    %26 = vector.shape_cast %25 : vector<1x128x128xbf16> to vector<128x128xbf16>
    %cst_17 = arith.constant dense<0.000000e+00> : vector<32x128xf32>
    %27 = tpu.matmul %24, %26, %cst_17 {dimension_numbers = #tpu.dot_dimension_numbers<[1], [0], [0], [1], [0, 0, 1, 1], [], []>} : vector<32x128xbf16>, vector<128x128xbf16>, vector<32x128xf32> -> vector<32x128xf32>
    %28 = arith.addf %23, %27 : vector<32x128xf32>
    %29 = vector.extract_strided_slice %0 {offsets = [0, 0], sizes = [32, 128], strides = [1, 1]} : vector<64x128xbf16> to vector<32x128xbf16>
    %c0_18 = arith.constant 0 : index
    %c0_19 = arith.constant 0 : index
    %c0_20 = arith.constant 0 : index
    %30 = vector.load %arg3[%c0_18, %c0_19, %c0_20] : memref<3x32x128xbf16, #tpu.memory_space<vmem>>, vector<1x32x128xbf16>
    %31 = vector.shape_cast %30 : vector<1x32x128xbf16> to vector<32x128xbf16>
    %32 = arith.mulf %31, %29 : vector<32x128xbf16>
    %c3 = arith.constant 3 : index
    %c0_21 = arith.constant 0 : index
    %c0_22 = arith.constant 0 : index
    %33 = vector.load %arg2[%c3, %c0_21, %c0_22] : memref<6x128x128xbf16, #tpu.memory_space<vmem>>, vector<1x128x128xbf16>
    %34 = vector.shape_cast %33 : vector<1x128x128xbf16> to vector<128x128xbf16>
    %cst_23 = arith.constant dense<0.000000e+00> : vector<32x128xf32>
    %35 = tpu.matmul %32, %34, %cst_23 {dimension_numbers = #tpu.dot_dimension_numbers<[1], [0], [0], [1], [0, 0, 1, 1], [], []>} : vector<32x128xbf16>, vector<128x128xbf16>, vector<32x128xf32> -> vector<32x128xf32>
    %36 = arith.addf %28, %35 : vector<32x128xf32>
    %c1_24 = arith.constant 1 : index
    %c0_25 = arith.constant 0 : index
    %c0_26 = arith.constant 0 : index
    %37 = vector.load %arg3[%c1_24, %c0_25, %c0_26] : memref<3x32x128xbf16, #tpu.memory_space<vmem>>, vector<1x32x128xbf16>
    %38 = vector.shape_cast %37 : vector<1x32x128xbf16> to vector<32x128xbf16>
    %39 = arith.mulf %38, %29 : vector<32x128xbf16>
    %c4 = arith.constant 4 : index
    %c0_27 = arith.constant 0 : index
    %c0_28 = arith.constant 0 : index
    %40 = vector.load %arg2[%c4, %c0_27, %c0_28] : memref<6x128x128xbf16, #tpu.memory_space<vmem>>, vector<1x128x128xbf16>
    %41 = vector.shape_cast %40 : vector<1x128x128xbf16> to vector<128x128xbf16>
    %cst_29 = arith.constant dense<0.000000e+00> : vector<32x128xf32>
    %42 = tpu.matmul %39, %41, %cst_29 {dimension_numbers = #tpu.dot_dimension_numbers<[1], [0], [0], [1], [0, 0, 1, 1], [], []>} : vector<32x128xbf16>, vector<128x128xbf16>, vector<32x128xf32> -> vector<32x128xf32>
    %43 = arith.addf %36, %42 : vector<32x128xf32>
    %c2_30 = arith.constant 2 : index
    %c0_31 = arith.constant 0 : index
    %c0_32 = arith.constant 0 : index
    %44 = vector.load %arg3[%c2_30, %c0_31, %c0_32] : memref<3x32x128xbf16, #tpu.memory_space<vmem>>, vector<1x32x128xbf16>
    %45 = vector.shape_cast %44 : vector<1x32x128xbf16> to vector<32x128xbf16>
    %46 = arith.mulf %45, %29 : vector<32x128xbf16>
    %c5 = arith.constant 5 : index
    %c0_33 = arith.constant 0 : index
    %c0_34 = arith.constant 0 : index
    %47 = vector.load %arg2[%c5, %c0_33, %c0_34] : memref<6x128x128xbf16, #tpu.memory_space<vmem>>, vector<1x128x128xbf16>
    %48 = vector.shape_cast %47 : vector<1x128x128xbf16> to vector<128x128xbf16>
    %cst_35 = arith.constant dense<0.000000e+00> : vector<32x128xf32>
    %49 = tpu.matmul %46, %48, %cst_35 {dimension_numbers = #tpu.dot_dimension_numbers<[1], [0], [0], [1], [0, 0, 1, 1], [], []>} : vector<32x128xbf16>, vector<128x128xbf16>, vector<32x128xf32> -> vector<32x128xf32>
    %50 = arith.addf %43, %49 : vector<32x128xf32>
    %cst_36 = arith.constant 0.000000e+00 : f32
    %51 = vector.broadcast %cst_36 : f32 to vector<32x128xf32>
    %52 = arith.maximumf %50, %51 : vector<32x128xf32>
    %53 = arith.truncf %52 : vector<32x128xf32> to vector<32x128xbf16>
    %c0_37 = arith.constant 0 : index
    %c0_38 = arith.constant 0 : index
    %54 = vector.load %arg5[%c0_37, %c0_38] : memref<48x32xbf16, #tpu.memory_space<vmem>>, vector<48x32xbf16>
    %55 = arith.extf %54 : vector<48x32xbf16> to vector<48x32xf32>
    %cst_39 = arith.constant dense<0.000000e+00> : vector<48xf32>
    %56 = vector.multi_reduction <add>, %55, %cst_39 [1] : vector<48x32xf32> to vector<48xf32>
    %57 = vector.shape_cast %56 : vector<48xf32> to vector<48x1xf32>
    %cst_40 = arith.constant 1.000000e+00 : f32
    %58 = vector.broadcast %cst_40 : f32 to vector<48x1xf32>
    %59 = arith.maximumf %57, %58 : vector<48x1xf32>
    %cst_41 = arith.constant 1.000000e+00 : f32
    %60 = vector.broadcast %cst_41 : f32 to vector<48x1xf32>
    %61 = arith.divf %60, %59 : vector<48x1xf32>
    %cst_42 = arith.constant dense<0.000000e+00> : vector<48x128xf32>
    %62 = tpu.matmul %54, %53, %cst_42 {dimension_numbers = #tpu.dot_dimension_numbers<[1], [0], [0], [1], [0, 0, 1, 1], [], []>} : vector<48x32xbf16>, vector<32x128xbf16>, vector<48x128xf32> -> vector<48x128xf32>
    %63 = vector.broadcast %61 : vector<48x1xf32> to vector<48x128xf32>
    %64 = arith.mulf %62, %63 : vector<48x128xf32>
    %65 = arith.truncf %64 : vector<48x128xf32> to vector<48x128xbf16>
    %c0_43 = arith.constant 0 : index
    %c0_44 = arith.constant 0 : index
    %66 = vector.load %arg8[%c0_43, %c0_44] : memref<16x128xf32, #tpu.memory_space<vmem>>, vector<16x128xf32>
    %67 = vector.extract_strided_slice %65 {offsets = [0, 0], sizes = [16, 128], strides = [1, 1]} : vector<48x128xbf16> to vector<16x128xbf16>
    %c0_45 = arith.constant 0 : index
    %c0_46 = arith.constant 0 : index
    %c0_47 = arith.constant 0 : index
    %68 = vector.load %arg6[%c0_45, %c0_46, %c0_47] : memref<6x128x128xbf16, #tpu.memory_space<vmem>>, vector<1x128x128xbf16>
    %69 = vector.shape_cast %68 : vector<1x128x128xbf16> to vector<128x128xbf16>
    %cst_48 = arith.constant dense<0.000000e+00> : vector<16x128xf32>
    %70 = tpu.matmul %67, %69, %cst_48 {dimension_numbers = #tpu.dot_dimension_numbers<[1], [0], [0], [1], [0, 0, 1, 1], [], []>} : vector<16x128xbf16>, vector<128x128xbf16>, vector<16x128xf32> -> vector<16x128xf32>
    %71 = arith.addf %66, %70 : vector<16x128xf32>
    %72 = vector.extract_strided_slice %65 {offsets = [16, 0], sizes = [16, 128], strides = [1, 1]} : vector<48x128xbf16> to vector<16x128xbf16>
    %c1_49 = arith.constant 1 : index
    %c0_50 = arith.constant 0 : index
    %c0_51 = arith.constant 0 : index
    %73 = vector.load %arg6[%c1_49, %c0_50, %c0_51] : memref<6x128x128xbf16, #tpu.memory_space<vmem>>, vector<1x128x128xbf16>
    %74 = vector.shape_cast %73 : vector<1x128x128xbf16> to vector<128x128xbf16>
    %cst_52 = arith.constant dense<0.000000e+00> : vector<16x128xf32>
    %75 = tpu.matmul %72, %74, %cst_52 {dimension_numbers = #tpu.dot_dimension_numbers<[1], [0], [0], [1], [0, 0, 1, 1], [], []>} : vector<16x128xbf16>, vector<128x128xbf16>, vector<16x128xf32> -> vector<16x128xf32>
    %76 = arith.addf %71, %75 : vector<16x128xf32>
    %77 = vector.extract_strided_slice %65 {offsets = [32, 0], sizes = [16, 128], strides = [1, 1]} : vector<48x128xbf16> to vector<16x128xbf16>
    %c2_53 = arith.constant 2 : index
    %c0_54 = arith.constant 0 : index
    %c0_55 = arith.constant 0 : index
    %78 = vector.load %arg6[%c2_53, %c0_54, %c0_55] : memref<6x128x128xbf16, #tpu.memory_space<vmem>>, vector<1x128x128xbf16>
    %79 = vector.shape_cast %78 : vector<1x128x128xbf16> to vector<128x128xbf16>
    %cst_56 = arith.constant dense<0.000000e+00> : vector<16x128xf32>
    %80 = tpu.matmul %77, %79, %cst_56 {dimension_numbers = #tpu.dot_dimension_numbers<[1], [0], [0], [1], [0, 0, 1, 1], [], []>} : vector<16x128xbf16>, vector<128x128xbf16>, vector<16x128xf32> -> vector<16x128xf32>
    %81 = arith.addf %76, %80 : vector<16x128xf32>
    %82 = vector.extract_strided_slice %53 {offsets = [0, 0], sizes = [16, 128], strides = [1, 1]} : vector<32x128xbf16> to vector<16x128xbf16>
    %c0_57 = arith.constant 0 : index
    %c0_58 = arith.constant 0 : index
    %c0_59 = arith.constant 0 : index
    %83 = vector.load %arg7[%c0_57, %c0_58, %c0_59] : memref<3x16x128xbf16, #tpu.memory_space<vmem>>, vector<1x16x128xbf16>
    %84 = vector.shape_cast %83 : vector<1x16x128xbf16> to vector<16x128xbf16>
    %85 = arith.mulf %84, %82 : vector<16x128xbf16>
    %c3_60 = arith.constant 3 : index
    %c0_61 = arith.constant 0 : index
    %c0_62 = arith.constant 0 : index
    %86 = vector.load %arg6[%c3_60, %c0_61, %c0_62] : memref<6x128x128xbf16, #tpu.memory_space<vmem>>, vector<1x128x128xbf16>
    %87 = vector.shape_cast %86 : vector<1x128x128xbf16> to vector<128x128xbf16>
    %cst_63 = arith.constant dense<0.000000e+00> : vector<16x128xf32>
    %88 = tpu.matmul %85, %87, %cst_63 {dimension_numbers = #tpu.dot_dimension_numbers<[1], [0], [0], [1], [0, 0, 1, 1], [], []>} : vector<16x128xbf16>, vector<128x128xbf16>, vector<16x128xf32> -> vector<16x128xf32>
    %89 = arith.addf %81, %88 : vector<16x128xf32>
    %c1_64 = arith.constant 1 : index
    %c0_65 = arith.constant 0 : index
    %c0_66 = arith.constant 0 : index
    %90 = vector.load %arg7[%c1_64, %c0_65, %c0_66] : memref<3x16x128xbf16, #tpu.memory_space<vmem>>, vector<1x16x128xbf16>
    %91 = vector.shape_cast %90 : vector<1x16x128xbf16> to vector<16x128xbf16>
    %92 = arith.mulf %91, %82 : vector<16x128xbf16>
    %c4_67 = arith.constant 4 : index
    %c0_68 = arith.constant 0 : index
    %c0_69 = arith.constant 0 : index
    %93 = vector.load %arg6[%c4_67, %c0_68, %c0_69] : memref<6x128x128xbf16, #tpu.memory_space<vmem>>, vector<1x128x128xbf16>
    %94 = vector.shape_cast %93 : vector<1x128x128xbf16> to vector<128x128xbf16>
    %cst_70 = arith.constant dense<0.000000e+00> : vector<16x128xf32>
    %95 = tpu.matmul %92, %94, %cst_70 {dimension_numbers = #tpu.dot_dimension_numbers<[1], [0], [0], [1], [0, 0, 1, 1], [], []>} : vector<16x128xbf16>, vector<128x128xbf16>, vector<16x128xf32> -> vector<16x128xf32>
    %96 = arith.addf %89, %95 : vector<16x128xf32>
    %c2_71 = arith.constant 2 : index
    %c0_72 = arith.constant 0 : index
    %c0_73 = arith.constant 0 : index
    %97 = vector.load %arg7[%c2_71, %c0_72, %c0_73] : memref<3x16x128xbf16, #tpu.memory_space<vmem>>, vector<1x16x128xbf16>
    %98 = vector.shape_cast %97 : vector<1x16x128xbf16> to vector<16x128xbf16>
    %99 = arith.mulf %98, %82 : vector<16x128xbf16>
    %c5_74 = arith.constant 5 : index
    %c0_75 = arith.constant 0 : index
    %c0_76 = arith.constant 0 : index
    %100 = vector.load %arg6[%c5_74, %c0_75, %c0_76] : memref<6x128x128xbf16, #tpu.memory_space<vmem>>, vector<1x128x128xbf16>
    %101 = vector.shape_cast %100 : vector<1x128x128xbf16> to vector<128x128xbf16>
    %cst_77 = arith.constant dense<0.000000e+00> : vector<16x128xf32>
    %102 = tpu.matmul %99, %101, %cst_77 {dimension_numbers = #tpu.dot_dimension_numbers<[1], [0], [0], [1], [0, 0, 1, 1], [], []>} : vector<16x128xbf16>, vector<128x128xbf16>, vector<16x128xf32> -> vector<16x128xf32>
    %103 = arith.addf %96, %102 : vector<16x128xf32>
    %104 = tpu.iota {dimensions = array<i32: 1>} : vector<16x128xi32>
    %c16_i32 = arith.constant 16 : i32
    %105 = vector.broadcast %c16_i32 : i32 to vector<16x128xi32>
    %106 = arith.cmpi slt, %104, %105 : vector<16x128xi32>
    %cst_78 = arith.constant -1.000000e+30 : f32
    %107 = vector.broadcast %cst_78 : f32 to vector<16x128xf32>
    %108 = arith.select %106, %103, %107 : vector<16x128xi1>, vector<16x128xf32>
    %cst_79 = arith.constant dense<0xFF800000> : vector<16xf32>
    %109 = vector.multi_reduction <maximumf>, %108, %cst_79 [1] : vector<16x128xf32> to vector<16xf32>
    %110 = vector.shape_cast %109 : vector<16xf32> to vector<16x1xf32>
    %111 = vector.broadcast %110 : vector<16x1xf32> to vector<16x128xf32>
    %112 = arith.subf %108, %111 : vector<16x128xf32>
    %113 = math.exp %112 : vector<16x128xf32>
    %cst_80 = arith.constant dense<0.000000e+00> : vector<16xf32>
    %114 = vector.multi_reduction <add>, %113, %cst_80 [1] : vector<16x128xf32> to vector<16xf32>
    %115 = vector.shape_cast %114 : vector<16xf32> to vector<16x1xf32>
    %116 = math.log %115 : vector<16x1xf32>
    %117 = vector.broadcast %116 : vector<16x1xf32> to vector<16x128xf32>
    %118 = arith.subf %112, %117 : vector<16x128xf32>
    %c0_81 = arith.constant 0 : index
    %c0_82 = arith.constant 0 : index
    %119 = vector.load %arg9[%c0_81, %c0_82] : memref<16x128xf32, #tpu.memory_space<vmem>>, vector<16x128xf32>
    tpu.vector_store %arg9[%c0_81, %c0_82], %118 {strides = array<i32>} : memref<16x128xf32, #tpu.memory_space<vmem>>, vector<16x128xf32>,
    return
  }
}

</mosaic_0001>

<bundles_post_ra>
// kernel: tpu_custom_call.1
= control target key start
LH: loop header
LB: loop body
LE: loop exit
PB: predicated region body
PF: predicated region fallthrough
CT: control target
= control target key end

     0   :  { %14 = vsyncpa [#allocation3], 0  ;;  %s3233_s0 = inlined_call_operand.vmem [shape: bf16[64,128], index: 0, kind: input, shape index: {}]   ;;  %s3234_s1 = inlined_call_operand.vmem [shape: bf16[96,64], index: 1, kind: input, shape index: {}]   ;;  %s3235_s2 = inlined_call_operand.hbm [shape: bf16[6,128,128], index: 2, kind: input, shape index: {}]   ;;  %s3236_s3 = inlined_call_operand.vmem [shape: bf16[3,32,128], index: 3, kind: input, shape index: {}]   ;;  %s3237_s4 = inlined_call_operand.vmem [shape: f32[32,128], index: 4, kind: input, shape index: {}]   ;;  %s3238_s5 = inlined_call_operand.vmem [shape: bf16[48,32], index: 5, kind: input, shape index: {}]   ;;  %s3239_s6 = inlined_call_operand.hbm [shape: bf16[6,128,128], index: 6, kind: input, shape index: {}]   ;;  %s3240_s7 = inlined_call_operand.vmem [shape: bf16[3,16,128], index: 7, kind: input, shape index: {}]   ;;  %s3241_s8 = inlined_call_operand.hbm [shape: f32[16,128], index: 8, kind: input, shape index: {}]   ;;  %s3242_s9 = inlined_call_operand.hbm [shape: f32[16,128], index: 9, kind: output, shape index: {}]  }
   0x1   :  { %15 = vsyncpa [#allocation6], 0 }
   0x2   :  { %16 = vsyncpa [#allocation4], 0  ;;  %s2864_s30 = smov [#allocation5]   ;;  %s2865_s11 = smov [#allocation2]  }
   0x3   :  { %s44_s10 = sshll.u32 %s2864_s30, 4  ;;  %s26_s12 = sshll.u32 %s2865_s11, 4  ;;  %s45_s10 = int_to_ptr.vmem [resolvable:$true] %s44_s10  ;;  %s2924_s12 = int_to_ptr.vmem [resolvable:$true] %s26_s12 }
   0x4   :  { %s2770_s15 = scalar_lea.hbm %s3239_s6, 6144 }
   0x5   :  { %p2771_p0 = scmp.ne.s32.totalorder %s3239_s6, %s2770_s15  ;;  %p2774_p1 = scmp.lt.u32.totalorder %s2770_s15, %s3239_s6 }
   0x7   :  { %p2776_p2 = pnand %p2774_p1, %p2771_p0 }
   0x9   :  { %2779 = shalt.err (!%p2776_p2)
}
   0xa   :  { %s2780_s20 = scalar_lea.vmem %s45_s10, 6144  ;;  %p2785_p4 = scmp.lt.s32.totalorder %s45_s10, %s45_s10 }
   0xb   :  { %p2781_p3 = scmp.ne.s32.totalorder %s45_s10, %s2780_s20  ;;  %p2786_p5 = scmp.lt.s32.totalorder %s2780_s20, %s2780_s20 }
   0xd   :  { %p2787_p6 = por %p2786_p5, %p2785_p4 }
   0xf   :  { %p2788_p7 = pnand %p2787_p6, %p2781_p3 }
  0x11   :  { %2791 = shalt.err (!%p2788_p7)
}
  0x12   :  { %s2866_s21 = smov 64   ;;  %s2867_s22 = smov 4  }
  0x13   :  { %50 = dma.hbm_to_vmem [thread:$0]  %s3239_s6, 6144, %s45_s10, [#allocation6], %s2866_s21, %s2866_s21, %s2867_s22  }
  0x14   :  { %s2792_s27 = scalar_lea.hbm %s3235_s2, 6144 }
  0x15   :  { %p2793_p8 = scmp.ne.s32.totalorder %s3235_s2, %s2792_s27  ;;  %p2796_p9 = scmp.lt.u32.totalorder %s2792_s27, %s3235_s2 }
  0x17   :  { %p2798_p10 = pnand %p2796_p9, %p2793_p8 }
  0x19   :  { %2801 = shalt.err (!%p2798_p10)
}
  0x1a   :  { %s2802_s13 = scalar_lea.vmem %s2924_s12, 6144  ;;  %p2807_p12 = scmp.lt.s32.totalorder %s2924_s12, %s2924_s12 }
  0x1b   :  { %p2803_p11 = scmp.ne.s32.totalorder %s2924_s12, %s2802_s13  ;;  %p2808_p13 = scmp.lt.s32.totalorder %s2802_s13, %s2802_s13 }
  0x1d   :  { %p2809_p0 = por %p2808_p13, %p2807_p12 }
  0x1f   :  { %p2810_p1 = pnand %p2809_p0, %p2803_p11 }
  0x21   :  { %2813 = shalt.err (!%p2810_p1)
}
  0x22   :  { %32 = dma.hbm_to_vmem [thread:$0]  %s3235_s2, 6144, %s2924_s12, [#allocation3], %s2866_s21, %s2866_s21, %s2867_s22  }
  0x23   :  { %s2868_s14 = smov [#allocation7]   ;;  %s2814_s18 = scalar_lea.hbm %s3241_s8, 256 }
  0x24   :  { %s58_s15 = sshll.u32 %s2868_s14, 4  ;;  %p2815_p2 = scmp.ne.s32.totalorder %s3241_s8, %s2814_s18  ;;  %s59_s15 = int_to_ptr.vmem [resolvable:$true] %s58_s15 }
  0x25   :  { %p2818_p3 = scmp.lt.u32.totalorder %s2814_s18, %s3241_s8 }
  0x27   :  { %p2820_p4 = pnand %p2818_p3, %p2815_p2 }
  0x29   :  { %2823 = shalt.err (!%p2820_p4)
}
  0x2a   :  { %s2824_s25 = scalar_lea.vmem %s59_s15, 256  ;;  %p2829_p6 = scmp.lt.s32.totalorder %s59_s15, %s59_s15 }
  0x2b   :  { %p2825_p5 = scmp.ne.s32.totalorder %s59_s15, %s2824_s25  ;;  %p2830_p7 = scmp.lt.s32.totalorder %s2824_s25, %s2824_s25 }
  0x2d   :  { %p2831_p8 = por %p2830_p7, %p2829_p6 }
  0x2f   :  { %p2832_p9 = pnand %p2831_p8, %p2825_p5 }
  0x31   :  { %2835 = shalt.err (!%p2832_p9)
}
  0x32   :  { %s2869_s2 = smov 128   ;;  %s2870_s12 = smov 8  }
  0x33   :  { %64 = dma.hbm_to_vmem [thread:$0]  %s3241_s8, 256, %s59_s15, [#allocation6], %s2869_s2, %s2869_s2, %s2870_s12  }
  0x34   :  { %2858 = dma.done.wait [#allocation3], 6144  }
  0x35   :  { %2859 = vsyncadd [#allocation3], 4294961152 }
  0x36   :  { %2860 = dma.done.wait [#allocation6], 6400  }
  0x37   :  { %2861 = vsyncadd [#allocation6], 4294960896  ;;  %v2973_v0 = vld [vmem:[%s3233_s0] sm:$0xf]  ;;  %v2978_v1 = vld [vmem:[%s3233_s0 + $0x4] sm:$0xf] }
  0x38   :  { %v2983_v2 = vld [vmem:[%s3233_s0 + $0x8] sm:$0xf]  ;;  %v2008_v3 = vcombine.low %v2973_v0, %v2978_v1  ;;  %v2990_v4 = vld [vmem:[%s3233_s0 + $0xc] sm:$0xf]  ;;  %v83_v6 = vld [vmem:[%s3234_s1] sm:$0xff]   ;;  %vm107_vm0 = vcmask 523264  }
  0x39   :  { %v2009_v5 = vcombine.low %v2983_v2, %v2990_v4  ;;  %v85_v7 = vld [vmem:[%s3234_s1 + $0x8] sm:$0xff]   ;;  %v2608_v8 = vld [vmem:[%s3233_s0 + $0x10] sm:$0xff]   ;;  %v95_v10 = vunpack.c.l.bf16 %v83_v6  ;;  %v96_v13 = vunpack.c.h.bf16 %v83_v6  ;;  %2282 = vmatprep.mubr.msk.bf16.mxu1 %vm107_vm0, %v83_v6  ;;  %v89_v14 = vld [vmem:[%s3234_s1 + $0x18] sm:$0xff]   ;;  %vm2872_vm1 = vmmov 0  }
  0x3a   :  { %2274 = vmatprep.subr.bf16.mxu1 %v2008_v3  ;;  %v97_v9 = vunpack.c.l.bf16 %v85_v7  ;;  %v87_v11 = vld [vmem:[%s3234_s1 + $0x10] sm:$0xff]   ;;  %v98_v12 = vunpack.c.h.bf16 %v85_v7  ;;  %v91_v17 = vld [vmem:[%s3234_s1 + $0x20] sm:$0xff]   ;;  %v93_v22 = vld [vmem:[%s3234_s1 + $0x28] sm:$0xff]   ;;  %v102_v23 = vunpack.c.h.bf16 %v89_v14  ;;  %v101_v24 = vunpack.c.l.bf16 %v89_v14 }
  0x3b   :  { %2275 = vmatpush3.bf16.msra.mxu1 %v2008_v3  ;;  %v108_v16 = vsel %vm107_vm0, %v95_v10, 0.0  ;;  %v111_v19 = vsel %vm107_vm0, %v96_v13, 0.0  ;;  %v100_v20 = vunpack.c.h.bf16 %v87_v11  ;;  %v99_v21 = vunpack.c.l.bf16 %v87_v11  ;;  %v2609_v27 = vld [vmem:[%s3233_s0 + $0x18] sm:$0xff]   ;;  %v2616_v36 = vld [vmem:[#allocation2] sm:$0xff]   ;;  %v2617_v37 = vld [vmem:[#allocation2 + $0x8] sm:$0xff]  }
  0x3c   :  { %2276 = vmatprep.subr.bf16.mxu1 %v2009_v5  ;;  %v114_v15 = vsel %vm107_vm0, %v97_v9, 0.0  ;;  %109 = vadd.xlane.f32.xlu0 %v108_v16  ;;  %v117_v18 = vsel %vm107_vm0, %v98_v12, 0.0  ;;  %v104_v25 = vunpack.c.h.bf16 %v91_v17  ;;  %v103_v26 = vunpack.c.l.bf16 %v91_v17  ;;  %v2618_v39 = vld [vmem:[#allocation2 + $0x10] sm:$0xff]   ;;  %v2619_v41 = vld [vmem:[#allocation2 + $0x18] sm:$0xff]   ;;  %v2620_v42 = vld [vmem:[#allocation2 + $0x20] sm:$0xff]  }
  0x3d   :  { %115 = vadd.xlane.f32.xlu1 %v114_v15  ;;  %v123_v28 = vsel %vm107_vm0, %v100_v20, 0.0  ;;  %v106_v29 = vunpack.c.h.bf16 %v93_v22  ;;  %v120_v30 = vsel %vm107_vm0, %v99_v21, 0.0  ;;  %v129_v31 = vsel %vm107_vm0, %v102_v23, 0.0  ;;  %v2621_v43 = vld [vmem:[#allocation2 + $0x28] sm:$0xff]   ;;  %v2622_v44 = vld [vmem:[#allocation2 + $0x30] sm:$0xff]   ;;  %v2623_v45 = vld [vmem:[#allocation2 + $0x38] sm:$0xff]  }
  0x3e   :  { %v126_v32 = vsel %vm107_vm0, %v101_v24, 0.0  ;;  %v135_v33 = vsel %vm107_vm0, %v104_v25, 0.0  ;;  %v132_v34 = vsel %vm107_vm0, %v103_v26, 0.0  ;;  %v105_v38 = vunpack.c.l.bf16 %v93_v22  ;;  %v2624_v46 = vld [vmem:[#allocation2 + $0x40] sm:$0xff]  }
  0x3f   :  { %2277 = vmatpush3.bf16.msra.mxu1 %v2009_v5  ;;  %v141_v35 = vsel %vm107_vm0, %v106_v29, 0.0  ;;  %vm1142_vm2 = vcmask 261120  }
  0x40   :  { %2278 = vmatprep.subr.bf16.mxu1 %v2608_v8  ;;  %112 = vadd.xlane.f32.xlu0 %v111_v19  ;;  %v138_v40 = vsel %vm107_vm0, %v105_v38, 0.0 }
  0x41   :  { %118 = vadd.xlane.f32.xlu1 %v117_v18 }
  0x43   :  { %2279 = vmatpush3.bf16.msra.mxu1 %v2608_v8 }
  0x44   :  { %2280 = vmatprep.subr.bf16.mxu1 %v2609_v27  ;;  %121 = vadd.xlane.f32.xlu0 %v120_v30 }
  0x45   :  { %124 = vadd.xlane.f32.xlu1 %v123_v28 }
  0x47   :  { %2281 = vmatpush3.bf16.msra.mxu1 %v2609_v27  ;;  %v2625_v27 = vld [vmem:[#allocation2 + $0x48] sm:$0xff]  }
  0x48   :  { %2294 = vmatprep.subr.bf16.mxu1 %v2616_v36  ;;  %127 = vadd.xlane.f32.xlu0 %v126_v32 }
  0x49   :  { %130 = vadd.xlane.f32.xlu1 %v129_v31 }
  0x4a   :  { %2283 = vmatmul.mubr.msk.bf16.vlgmr.msra.gmra.mrb[0].mxu1 %vm107_vm0, %v85_v7 }
  0x4b   :  { %2286 = vmatprep.mubr.msk.bf16.mxu1 %vm107_vm0, %v87_v11  ;;  %2295 = vmatpush3.bf16.msra.mxu1 %v2616_v36 }
  0x4c   :  { %2296 = vmatprep.subr.bf16.mxu1 %v2617_v37  ;;  %133 = vadd.xlane.f32.xlu0 %v132_v34 }
  0x4d   :  { %136 = vadd.xlane.f32.xlu1 %v135_v33 }
  0x4f   :  { %2297 = vmatpush3.bf16.msra.mxu1 %v2617_v37 }
  0x50   :  { %2298 = vmatprep.subr.bf16.mxu1 %v2618_v39  ;;  %139 = vadd.xlane.f32.xlu0 %v138_v40 }
  0x51   :  { %142 = vadd.xlane.f32.xlu1 %v141_v35  ;;  %v2626_v35 = vld [vmem:[#allocation2 + $0x50] sm:$0xff]  }
  0x52   :  { %2287 = vmatmul.mubr.msk.bf16.gmra.mrb[4].mxu1 %vm107_vm0, %v89_v14 }
  0x53   :  { %2290 = vmatprep.mubr.msk.bf16.mxu1 %vm107_vm0, %v91_v17  ;;  %2299 = vmatpush3.bf16.msra.mxu1 %v2618_v39 }
  0x54   :  { %2300 = vmatprep.subr.bf16.mxu1 %v2619_v41 }
  0x57   :  { %2301 = vmatpush3.bf16.msra.mxu1 %v2619_v41 }
  0x58   :  { %2302 = vmatprep.subr.bf16.mxu1 %v2620_v42 }
  0x5a   :  { %2291 = vmatmul.mubr.msk.bf16.gmra.mrb[8].mxu1 %vm107_vm0, %v93_v22 }
  0x5b   :  { %2303 = vmatpush3.bf16.msra.mxu1 %v2620_v42 }
  0x5c   :  { %2304 = vmatprep.subr.bf16.mxu1 %v2621_v43 }
  0x5f   :  { %2305 = vmatpush3.bf16.msra.mxu1 %v2621_v43  ;;  %v2627_v43 = vld [vmem:[#allocation2 + $0x58] sm:$0xff]  }
  0x60   :  { %2306 = vmatprep.subr.bf16.mxu1 %v2622_v44 }
  0x63   :  { %2307 = vmatpush3.bf16.msra.mxu1 %v2622_v44 }
  0x64   :  { %2308 = vmatprep.subr.bf16.mxu1 %v2623_v45 }
  0x67   :  { %2309 = vmatpush3.bf16.msra.mxu1 %v2623_v45 }
  0x68   :  { %2314 = vmatprep.subr.bf16.mxu1 %v2624_v46 }
  0xc9   :  { %v110_v47 = vpop.xlane.xlu0 %109 }
  0xca   :  { %v116_v48 = vpop.xlane.xlu1 %115  ;;  %v144_v57 = vmax.f32 %v110_v47, 1.0 }
  0xcb   :  { %v146_v53 = vmax.f32 %v116_v48, 1.0 }
  0xcd   :  { %v113_v49 = vpop.xlane.xlu0 %112  ;;  %2724 = vrcp.f32 %v146_v53 }
  0xce   :  { %v119_v50 = vpop.xlane.xlu1 %118  ;;  %v145_v55 = vmax.f32 %v113_v49, 1.0 }
  0xcf   :  { %v147_v54 = vmax.f32 %v119_v50, 1.0 }
  0xd1   :  { %v122_v51 = vpop.xlane.xlu0 %121  ;;  %2726 = vrcp.f32 %v147_v54 }
  0xd2   :  { %v125_v52 = vpop.xlane.xlu1 %124  ;;  %2728 = vrcp.f32 %v145_v55  ;;  %v148_v61 = vmax.f32 %v122_v51, 1.0  ;;  %v2628_v51 = vld [vmem:[#allocation2 + $0x60] sm:$0xff]  }
  0xd3   :  { %2730 = vrcp.f32 %v144_v57  ;;  %v149_v3 = vmax.f32 %v125_v52, 1.0  ;;  %v2629_v57 = vld [vmem:[#allocation2 + $0x68] sm:$0xff]  }
  0xd5   :  { %v128_v56 = vpop.xlane.xlu0 %127 }
  0xd6   :  { %v131_v58 = vpop.xlane.xlu1 %130  ;;  %v150_v60 = vmax.f32 %v128_v56, 1.0 }
  0xd7   :  { %v151_v63 = vmax.f32 %v131_v58, 1.0  ;;  %v2725_v6 = vpop.eup %2724  ;;  %v2630_v58 = vld [vmem:[#allocation2 + $0x70] sm:$0xff]  }
  0xd8   :  { %2732 = vrcp.f32 %v150_v60  ;;  %v2632_v60 = vld [vmem:[#allocation2 + $0x80] sm:$0xff]  }
  0xd9   :  { %v134_v59 = vpop.xlane.xlu0 %133  ;;  %2734 = vrcp.f32 %v148_v61  ;;  %v2633_v61 = vld [vmem:[#allocation2 + $0x88] sm:$0xff]  }
  0xda   :  { %v137_v62 = vpop.xlane.xlu1 %136  ;;  %2736 = vrcp.f32 %v151_v63  ;;  %v152_v13 = vmax.f32 %v134_v59, 1.0  ;;  %v2631_v59 = vld [vmem:[#allocation2 + $0x78] sm:$0xff]  }
  0xdb   :  { %2738 = vrcp.f32 %v149_v3  ;;  %v2727_v8 = vpop.eup %2726  ;;  %v153_v20 = vmax.f32 %v137_v62, 1.0  ;;  %v2634_v62 = vld [vmem:[#allocation2 + $0x90] sm:$0xff]   ;;  %v2635_v63 = vld [vmem:[#allocation2 + $0x98] sm:$0xff]   ;;  %v2636_v3 = vld [vmem:[#allocation2 + $0xa0] sm:$0xff]  }
  0xdc   :  { %v2729_v11 = vpop.eup %2728 }
  0xdd   :  { %v140_v5 = vpop.xlane.xlu0 %139  ;;  %v2731_v16 = vpop.eup %2730 }
  0xde   :  { %v143_v7 = vpop.xlane.xlu1 %142  ;;  %v154_v10 = vmax.f32 %v140_v5, 1.0  ;;  %v2637_v5 = vld [vmem:[#allocation2 + $0xa8] sm:$0xff]  }
  0xdf   :  { %v155_v15 = vmax.f32 %v143_v7, 1.0  ;;  %v2639_v7 = vld [vmem:[#allocation2 + $0xb8] sm:$0xff]  }
  0xe0   :  { %2740 = vrcp.f32 %v154_v10 }
  0xe1   :  { %2742 = vrcp.f32 %v152_v13 }
  0xe2   :  { %v2733_v24 = vpop.eup %2732  ;;  %2744 = vrcp.f32 %v155_v15  ;;  %v2642_v15 = vld [vmem:[#allocation2 + $0xd0] sm:$0xff]  }
  0xe3   :  { %v2735_v26 = vpop.eup %2734  ;;  %2746 = vrcp.f32 %v153_v20  ;;  %v710_v20 = vld [vmem:[%s3236_s3 + $0x8] sm:$0xf] }
  0xe4   :  { %v2737_v28 = vpop.eup %2736 }
  0xe5   :  { %v2739_v30 = vpop.eup %2738 }
  0xea   :  { %v2741_v40 = vpop.eup %2740 }
  0xeb   :  { %v2743_v42 = vpop.eup %2742 }
  0xec   :  { %v2745_v44 = vpop.eup %2744 }
  0xed   :  { %v2747_v47 = vpop.eup %2746 }
 0x11d   :  { %v2284_v9 = vpop.f32.mrb[0].mxu1 }
 0x11e   :  { %v286_v12 = vpop.f32.mrb[1].mxu1  ;;  %v335_v17 = vmul.f32 %v2725_v6, %v2284_v9  ;;  %v2638_v6 = vld [vmem:[#allocation2 + $0xb0] sm:$0xff]   ;;  %v709_v9 = vld [vmem:[%s3236_s3 + $0x4] sm:$0xf] }
 0x11f   :  { %v2285_v14 = vpop.f32.mrb[2].mxu1  ;;  %v333_v21 = vmul.f32 %v2731_v16, %v286_v12  ;;  %v2640_v12 = vld [vmem:[#allocation2 + $0xc0] sm:$0xff]   ;;  %v2643_v16 = vld [vmem:[#allocation2 + $0xd8] sm:$0xff]  }
 0x120   :  { %v336_v18 = vmul.f32 %v2727_v8, %v2285_v14  ;;  %v289_v19 = vpop.f32.mrb[3].mxu1  ;;  %v708_v8 = vld [vmem:[%s3236_s3] sm:$0xf]  ;;  %v2641_v14 = vld [vmem:[#allocation2 + $0xc8] sm:$0xff]  }
 0x121   :  { %v334_v22 = vmul.f32 %v2729_v11, %v289_v19  ;;  %v712_v10 = vmul.bf16 %v708_v8, %v2973_v0  ;;  %v713_v11 = vmul.bf16 %v709_v9, %v2978_v1  ;;  %v2646_v19 = vld [vmem:[#allocation2 + $0xf0] sm:$0xff]  }
 0x122   :  { %v346_v23 = vpack.c.bf16 %v336_v18, %v335_v17  ;;  %v2644_v17 = vld [vmem:[#allocation2 + $0xe0] sm:$0xff]   ;;  %v2645_v18 = vld [vmem:[#allocation2 + $0xe8] sm:$0xff]  }
 0x123   :  { %v345_v25 = vpack.c.bf16 %v334_v22, %v333_v21  ;;  %v2042_v13 = vcombine.low %v712_v10, %v713_v11  ;;  %v711_v21 = vld [vmem:[%s3236_s3 + $0xc] sm:$0xf]  ;;  %v2647_v22 = vld [vmem:[#allocation2 + $0xf8] sm:$0xff]  }
 0x125   :  { %2310 = vmatprep.mubr.bf16.mxu1 %v345_v25  ;;  %v2288_v29 = vpop.f32.mrb[4].mxu1  ;;  %v714_v25 = vmul.bf16 %v710_v20, %v2983_v2 }
 0x126   :  { %2311 = vmatmul.mubr.bf16.vlgmr.msra.gmra.mrb[12].mxu1 %v346_v23  ;;  %v339_v31 = vmul.f32 %v2733_v24, %v2288_v29  ;;  %v302_v32 = vpop.f32.mrb[5].mxu1  ;;  %v2052_v23 = vld [vmem:[%s3236_s3 + $0x10] sm:$0xf]  ;;  %v2053_v24 = vld [vmem:[%s3236_s3 + $0x14] sm:$0xf]  ;;  %v2648_v29 = vld [vmem:[#allocation2 + $0x100] sm:$0xff]  }
 0x127   :  { %2315 = vmatpush3.bf16.msra.mxu1 %v2624_v46  ;;  %v337_v33 = vmul.f32 %v2735_v26, %v302_v32  ;;  %v2289_v34 = vpop.f32.mrb[6].mxu1  ;;  %v715_v26 = vmul.bf16 %v711_v21, %v2990_v4  ;;  %v2649_v32 = vld [vmem:[#allocation2 + $0x108] sm:$0xff]  }
 0x128   :  { %2316 = vmatprep.subr.bf16.mxu1 %v2625_v27  ;;  %v340_v36 = vmul.f32 %v2737_v28, %v2289_v34  ;;  %v305_v37 = vpop.f32.mrb[7].mxu1  ;;  %v852_v28 = vmul.bf16 %v2053_v24, %v2978_v1  ;;  %v2651_v34 = vld [vmem:[#allocation2 + $0x118] sm:$0xff]  }
 0x129   :  { %v338_v38 = vmul.f32 %v2739_v30, %v305_v37  ;;  %v2043_v30 = vcombine.low %v714_v25, %v715_v26  ;;  %v2654_v37 = vld [vmem:[#allocation2 + $0x130] sm:$0xff]  }
 0x12a   :  { %v348_v39 = vpack.c.bf16 %v340_v36, %v339_v31  ;;  %v2653_v36 = vld [vmem:[#allocation2 + $0x128] sm:$0xff]  }
 0x12b   :  { %2317 = vmatpush3.bf16.msra.mxu1 %v2625_v27  ;;  %v347_v41 = vpack.c.bf16 %v338_v38, %v337_v33  ;;  %v851_v27 = vmul.bf16 %v2052_v23, %v2973_v0  ;;  %v2650_v33 = vld [vmem:[#allocation2 + $0x110] sm:$0xff]   ;;  %v2054_v38 = vld [vmem:[%s3236_s3 + $0x18] sm:$0xf] }
 0x12c   :  { %2318 = vmatprep.subr.bf16.mxu1 %v2626_v35 }
 0x12d   :  { %2330 = vmatprep.mubr.bf16.mxu1 %v347_v41  ;;  %v2292_v45 = vpop.f32.mrb[8].mxu1  ;;  %v2056_v31 = vcombine.low %v851_v27, %v852_v28  ;;  %v2066_v41 = vld [vmem:[%s3236_s3 + $0x20] sm:$0xf] }
 0x12e   :  { %v343_v48 = vmul.f32 %v2741_v40, %v2292_v45  ;;  %v318_v46 = vpop.f32.mrb[9].mxu1  ;;  %v2655_v40 = vld [vmem:[#allocation2 + $0x138] sm:$0xff]   ;;  %v990_v45 = vmul.bf16 %v2066_v41, %v2973_v0  ;;  %v2660_v0 = vld [vmem:[#allocation2 + $0x160] sm:$0xff]  }
 0x12f   :  { %2319 = vmatpush3.bf16.msra.mxu1 %v2626_v35  ;;  %v341_v49 = vmul.f32 %v2743_v42, %v318_v46  ;;  %v2293_v50 = vpop.f32.mrb[10].mxu1  ;;  %v2652_v35 = vld [vmem:[#allocation2 + $0x120] sm:$0xff]  }
 0x130   :  { %2320 = vmatprep.subr.bf16.mxu1 %v2627_v43  ;;  %v344_v52 = vmul.f32 %v2745_v44, %v2293_v50  ;;  %v321_v53 = vpop.f32.mrb[11].mxu1  ;;  %v2067_v42 = vld [vmem:[%s3236_s3 + $0x24] sm:$0xf]  ;;  %v2657_v50 = vld [vmem:[#allocation2 + $0x148] sm:$0xff]  }
 0x131   :  { %v342_v54 = vmul.f32 %v2747_v47, %v321_v53  ;;  %v991_v47 = vmul.bf16 %v2067_v42, %v2978_v1  ;;  %v2661_v1 = vld [vmem:[#allocation2 + $0x168] sm:$0xff]  }
 0x132   :  { %v350_v55 = vpack.c.bf16 %v344_v52, %v343_v48  ;;  %v2656_v48 = vld [vmem:[#allocation2 + $0x140] sm:$0xff]   ;;  %v2068_v52 = vld [vmem:[%s3236_s3 + $0x28] sm:$0xf]  ;;  %v2069_v53 = vld [vmem:[%s3236_s3 + $0x2c] sm:$0xf] }
 0x133   :  { %2321 = vmatpush3.bf16.msra.mxu1 %v2627_v43  ;;  %v349_v56 = vpack.c.bf16 %v342_v54, %v341_v49  ;;  %v853_v43 = vmul.bf16 %v2054_v38, %v2983_v2  ;;  %v2070_v49 = vcombine.low %v990_v45, %v991_v47  ;;  %v2659_v2 = vld [vmem:[#allocation2 + $0x158] sm:$0xff]   ;;  %v2122_v38 = vld [vmem:[%s3240_s7 + $0xc] sm:$0xf] }
 0x134   :  { %2322 = vmatprep.subr.bf16.mxu1 %v2628_v51  ;;  %v2663_v54 = vld [vmem:[#allocation2 + $0x178] sm:$0xff]  }
 0x137   :  { %2323 = vmatpush3.bf16.msra.mxu1 %v2628_v51  ;;  %v2658_v51 = vld [vmem:[#allocation2 + $0x150] sm:$0xff]  }
 0x138   :  { %2324 = vmatprep.subr.bf16.mxu1 %v2629_v57 }
 0x13b   :  { %2325 = vmatpush3.bf16.msra.mxu1 %v2629_v57  ;;  %v2769_v57 = vld [vmem:[%s3233_s0 + $0xc] sm:$0xf] }
 0x13c   :  { %2326 = vmatprep.subr.bf16.mxu1 %v2630_v58 }
 0x13f   :  { %2327 = vmatpush3.bf16.msra.mxu1 %v2630_v58  ;;  %v993_v58 = vmul.bf16 %v2769_v57, %v2069_v53  ;;  %v2673_v53 = vld [vmem:[#allocation5 + $0x30] sm:$0xff]  }
 0x140   :  { %2328 = vmatprep.subr.bf16.mxu1 %v2631_v59 }
 0x143   :  { %2329 = vmatpush3.bf16.msra.mxu1 %v2631_v59 }
 0x144   :  { %2334 = vmatprep.subr.bf16.mxu1 %v2632_v60 }
 0x146   :  { %2331 = vmatmul.mubr.bf16.vlgmr.msra.gmra.mrb[12].mxu1 %v348_v39  ;;  %v2055_v39 = vld [vmem:[%s3236_s3 + $0x1c] sm:$0xf] }
 0x147   :  { %2335 = vmatpush3.bf16.msra.mxu1 %v2632_v60  ;;  %2350 = vmatprep.mubr.bf16.mxu1 %v349_v56  ;;  %v854_v44 = vmul.bf16 %v2055_v39, %v2990_v4  ;;  %v2662_v4 = vld [vmem:[#allocation2 + $0x170] sm:$0xff]   ;;  %v2871_v60 = vmov 0.0  }
 0x148   :  { %2336 = vmatprep.subr.bf16.mxu1 %v2633_v61  ;;  %2414 = vmatprep.subr.bf16.mxu0 %v2871_v60  ;;  %v2133_v39 = vld [vmem:[%s3240_s7 + $0x14] sm:$0xf] }
 0x149   :  { %v2057_v46 = vcombine.low %v853_v43, %v854_v44  ;;  %2418 = vmatprep.mubr.msk.bf16.mxu0 %vm2872_vm1, %v2871_v60 }
 0x14b   :  { %2337 = vmatpush3.bf16.msra.mxu1 %v2633_v61  ;;  %v1130_v61 = vld [vmem:[%s3238_s5] sm:$0xff]  }
 0x14c   :  { %2338 = vmatprep.subr.bf16.mxu1 %v2634_v62 }
 0x14f   :  { %2339 = vmatpush3.bf16.msra.mxu1 %v2634_v62  ;;  %v1136_v62 = vunpack.c.l.bf16 %v1130_v61 }
 0x150   :  { %2340 = vmatprep.subr.bf16.mxu1 %v2635_v63 }
 0x153   :  { %2341 = vmatpush3.bf16.msra.mxu1 %v2635_v63  ;;  %v1137_v63 = vunpack.c.h.bf16 %v1130_v61 }
 0x154   :  { %2342 = vmatprep.subr.bf16.mxu1 %v2636_v3 }
 0x157   :  { %2343 = vmatpush3.bf16.msra.mxu1 %v2636_v3  ;;  %v1143_v3 = vsel %vm1142_vm2, %v1136_v62, 0.0 }
 0x158   :  { %2344 = vmatprep.subr.bf16.mxu1 %v2637_v5  ;;  %1144 = vadd.xlane.f32.xlu0 %v1143_v3 }
 0x15b   :  { %2345 = vmatpush3.bf16.msra.mxu1 %v2637_v5  ;;  %v1146_v5 = vsel %vm1142_vm2, %v1137_v63, 0.0 }
 0x15c   :  { %2346 = vmatprep.subr.bf16.mxu1 %v2638_v6  ;;  %1147 = vadd.xlane.f32.xlu1 %v1146_v5 }
 0x15f   :  { %2347 = vmatpush3.bf16.msra.mxu1 %v2638_v6  ;;  %v1132_v6 = vld [vmem:[%s3238_s5 + $0x8] sm:$0xff]  }
 0x160   :  { %2348 = vmatprep.subr.bf16.mxu1 %v2639_v7  ;;  %v1139_v8 = vunpack.c.h.bf16 %v1132_v6  ;;  %v1138_v9 = vunpack.c.l.bf16 %v1132_v6 }
 0x163   :  { %2349 = vmatpush3.bf16.msra.mxu1 %v2639_v7  ;;  %v3102_v7 = vld [vmem:[%s3238_s5 + $0x10] sm:$0xff]  }
 0x164   :  { %2354 = vmatprep.subr.bf16.mxu1 %v2640_v12  ;;  %v1141_v10 = vunpack.c.h.bf16 %v3102_v7  ;;  %v1140_v11 = vunpack.c.l.bf16 %v3102_v7 }
 0x166   :  { %2351 = vmatmul.mubr.bf16.vlgmr.msra.gmra.mrb[12].mxu1 %v350_v55  ;;  %v2768_v55 = vld [vmem:[%s3233_s0 + $0x8] sm:$0xf] }
 0x167   :  { %2355 = vmatpush3.bf16.msra.mxu1 %v2640_v12  ;;  %2370 = vmatprep.mubr.bf16.mxu1 %v2042_v13  ;;  %v992_v56 = vmul.bf16 %v2768_v55, %v2068_v52  ;;  %v1152_v12 = vsel %vm1142_vm2, %v1139_v8, 0.0  ;;  %v1149_v13 = vsel %vm1142_vm2, %v1138_v9, 0.0  ;;  %v2672_v52 = vld [vmem:[#allocation5 + $0x28] sm:$0xff]  }
 0x168   :  { %2356 = vmatprep.subr.bf16.mxu1 %v2641_v14  ;;  %1153 = vadd.xlane.f32.xlu1 %v1152_v12 }
 0x169   :  { %v2071_v59 = vcombine.low %v992_v56, %v993_v58  ;;  %1150 = vadd.xlane.f32.xlu0 %v1149_v13 }
 0x16b   :  { %2357 = vmatpush3.bf16.msra.mxu1 %v2641_v14  ;;  %v1158_v14 = vsel %vm1142_vm2, %v1141_v10, 0.0 }
 0x16c   :  { %2358 = vmatprep.subr.bf16.mxu1 %v2642_v15  ;;  %1159 = vadd.xlane.f32.xlu1 %v1158_v14 }
 0x16f   :  { %2359 = vmatpush3.bf16.msra.mxu1 %v2642_v15  ;;  %v1155_v15 = vsel %vm1142_vm2, %v1140_v11, 0.0 }
 0x170   :  { %2360 = vmatprep.subr.bf16.mxu1 %v2643_v16  ;;  %1156 = vadd.xlane.f32.xlu0 %v1155_v15 }
 0x173   :  { %2361 = vmatpush3.bf16.msra.mxu1 %v2643_v16  ;;  %v353_v16 = vld [vmem:[%s3237_s4 + $0x10] sm:$0xff] }
 0x174   :  { %2362 = vmatprep.subr.bf16.mxu1 %v2644_v17 }
 0x177   :  { %2363 = vmatpush3.bf16.msra.mxu1 %v2644_v17  ;;  %v351_v17 = vld [vmem:[%s3237_s4] sm:$0xff] }
 0x178   :  { %2364 = vmatprep.subr.bf16.mxu1 %v2645_v18 }
 0x17b   :  { %2365 = vmatpush3.bf16.msra.mxu1 %v2645_v18 }
 0x17c   :  { %2366 = vmatprep.subr.bf16.mxu1 %v2646_v19 }
 0x17f   :  { %2367 = vmatpush3.bf16.msra.mxu1 %v2646_v19  ;;  %v354_v19 = vld [vmem:[%s3237_s4 + $0x18] sm:$0xff] }
 0x180   :  { %2368 = vmatprep.subr.bf16.mxu1 %v2647_v22 }
 0x183   :  { %2369 = vmatpush3.bf16.msra.mxu1 %v2647_v22  ;;  %v352_v22 = vld [vmem:[%s3237_s4 + $0x8] sm:$0xff] }
 0x184   :  { %2374 = vmatprep.subr.bf16.mxu1 %v2648_v29 }
 0x186   :  { %2371 = vmatmul.mubr.bf16.vlgmr.msra.gmra.mrb[12].mxu1 %v2043_v30  ;;  %v1594_v30 = vld [vmem:[%s3240_s7] sm:$0xf] }
 0x187   :  { %2375 = vmatpush3.bf16.msra.mxu1 %v2648_v29  ;;  %2390 = vmatprep.mubr.bf16.mxu1 %v2056_v31 }
 0x188   :  { %2376 = vmatprep.subr.bf16.mxu1 %v2649_v32 }
 0x18b   :  { %2377 = vmatpush3.bf16.msra.mxu1 %v2649_v32 }
 0x18c   :  { %2378 = vmatprep.subr.bf16.mxu1 %v2650_v33 }
 0x18f   :  { %2379 = vmatpush3.bf16.msra.mxu1 %v2650_v33  ;;  %v2121_v33 = vld [vmem:[%s3240_s7 + $0x8] sm:$0xf] }
 0x190   :  { %2380 = vmatprep.subr.bf16.mxu1 %v2651_v34 }
 0x193   :  { %2381 = vmatpush3.bf16.msra.mxu1 %v2651_v34  ;;  %v2132_v34 = vld [vmem:[%s3240_s7 + $0x10] sm:$0xf] }
 0x194   :  { %2382 = vmatprep.subr.bf16.mxu1 %v2652_v35 }
 0x197   :  { %2383 = vmatpush3.bf16.msra.mxu1 %v2652_v35 }
 0x198   :  { %2384 = vmatprep.subr.bf16.mxu1 %v2653_v36 }
 0x19b   :  { %2385 = vmatpush3.bf16.msra.mxu1 %v2653_v36 }
 0x19c   :  { %2386 = vmatprep.subr.bf16.mxu1 %v2654_v37 }
 0x19f   :  { %2387 = vmatpush3.bf16.msra.mxu1 %v2654_v37  ;;  %v1595_v37 = vld [vmem:[%s3240_s7 + $0x4] sm:$0xf]  ;;  %s2873_s7 = smov [#allocation8]  }
 0x1a0   :  { %2388 = vmatprep.subr.bf16.mxu1 %v2655_v40  ;;  %s1989_s11 = sshll.u32 %s2873_s7, 4  ;;  %s1990_s11 = int_to_ptr.vmem [resolvable:$true] %s1989_s11 }
 0x1a1   :  { %s2836_s3 = scalar_lea.vmem %s1990_s11, 256  ;;  %p2841_p11 = scmp.lt.s32.totalorder %s1990_s11, %s1990_s11 }
 0x1a2   :  { %p2837_p10 = scmp.ne.s32.totalorder %s1990_s11, %s2836_s3  ;;  %p2842_p12 = scmp.lt.s32.totalorder %s2836_s3, %s2836_s3 }
 0x1a3   :  { %2389 = vmatpush3.bf16.msra.mxu1 %v2655_v40 }
 0x1a4   :  { %2394 = vmatprep.subr.bf16.mxu1 %v2656_v48  ;;  %p2843_p13 = por %p2842_p12, %p2841_p11 }
 0x1a6   :  { %2391 = vmatmul.mubr.bf16.vlgmr.msra.gmra.mrb[12].mxu1 %v2057_v46  ;;  %p2844_p0 = pnand %p2843_p13, %p2837_p10 }
 0x1a7   :  { %2395 = vmatpush3.bf16.msra.mxu1 %v2656_v48  ;;  %2410 = vmatprep.mubr.bf16.mxu1 %v2070_v49 }
 0x1a8   :  { %2396 = vmatprep.subr.bf16.mxu1 %v2657_v50 }
 0x1ab   :  { %2397 = vmatpush3.bf16.msra.mxu1 %v2657_v50 }
 0x1ac   :  { %2398 = vmatprep.subr.bf16.mxu1 %v2658_v51 }
 0x1af   :  { %2399 = vmatpush3.bf16.msra.mxu1 %v2658_v51  ;;  %v2667_v51 = vld [vmem:[#allocation5] sm:$0xff]  }
 0x1b0   :  { %2400 = vmatprep.subr.bf16.mxu1 %v2659_v2 }
 0x1b3   :  { %2401 = vmatpush3.bf16.msra.mxu1 %v2659_v2  ;;  %v2668_v2 = vld [vmem:[#allocation5 + $0x8] sm:$0xff]  }
 0x1b4   :  { %2402 = vmatprep.subr.bf16.mxu1 %v2660_v0 }
 0x1b7   :  { %2403 = vmatpush3.bf16.msra.mxu1 %v2660_v0  ;;  %v2669_v0 = vld [vmem:[#allocation5 + $0x10] sm:$0xff]  }
 0x1b8   :  { %2404 = vmatprep.subr.bf16.mxu1 %v2661_v1 }
 0x1bb   :  { %2405 = vmatpush3.bf16.msra.mxu1 %v2661_v1  ;;  %v2670_v1 = vld [vmem:[#allocation5 + $0x18] sm:$0xff]  }
 0x1bc   :  { %2406 = vmatprep.subr.bf16.mxu1 %v2662_v4 }
 0x1bf   :  { %2407 = vmatpush3.bf16.msra.mxu1 %v2662_v4  ;;  %v2671_v4 = vld [vmem:[#allocation5 + $0x20] sm:$0xff]  }
 0x1c0   :  { %2408 = vmatprep.subr.bf16.mxu1 %v2663_v54 }
 0x1c3   :  { %2409 = vmatpush3.bf16.msra.mxu1 %v2663_v54  ;;  %v2674_v54 = vld [vmem:[#allocation5 + $0x38] sm:$0xff]  }
 0x1c6   :  { %2411 = vmatmul.mubr.bf16.vlgmr.msra.gmra.mrb[12].mxu1 %v2071_v59 }
 0x1e5   :  { %v1145_v55 = vpop.xlane.xlu0 %1144 }
 0x1e6   :  { %v1161_v57 = vmax.f32 %v1145_v55, 1.0  ;;  %v2696_v55 = vld [vmem:[#allocation5 + $0xe8] sm:$0xff]  }
 0x1e8   :  { %2748 = vrcp.f32 %v1161_v57  ;;  %v2698_v57 = vld [vmem:[#allocation5 + $0xf8] sm:$0xff]  }
 0x1e9   :  { %v1148_v56 = vpop.xlane.xlu1 %1147 }
 0x1ea   :  { %v1162_v58 = vmax.f32 %v1148_v56, 1.0  ;;  %v2697_v56 = vld [vmem:[#allocation5 + $0xf0] sm:$0xff]  }
 0x1ec   :  { %2750 = vrcp.f32 %v1162_v58  ;;  %v2699_v58 = vld [vmem:[#allocation5 + $0x100] sm:$0xff]  }
 0x1f2   :  { %v2749_v5 = vpop.eup %2748 }
 0x1f6   :  { %v1151_v59 = vpop.xlane.xlu0 %1150 }
 0x1f7   :  { %v1163_v62 = vmax.f32 %v1151_v59, 1.0  ;;  %v2700_v59 = vld [vmem:[#allocation5 + $0x108] sm:$0xff]  }
 0x1f9   :  { %2752 = vrcp.f32 %v1163_v62  ;;  %v2702_v62 = vld [vmem:[#allocation5 + $0x118] sm:$0xff]  }
 0x1fd   :  { %v1157_v3 = vpop.xlane.xlu0 %1156 }
 0x1fe   :  { %v1165_v9 = vmax.f32 %v1157_v3, 1.0  ;;  %v2705_v3 = vld [vmem:[#allocation5 + $0x130] sm:$0xff]  }
 0x299   :  { %v2412_v18 = vpop.f32.mrb[12].mxu1 }
 0x29a   :  { %v2550_v20 = vadd.f32 %v2412_v18, %v353_v16  ;;  %v1105_v21 = vpop.f32.mrb[13].mxu1  ;;  %v2675_v16 = vld [vmem:[#allocation5 + $0x40] sm:$0xff]  }
 0x29b   :  { %v2551_v23 = vadd.f32 %v1105_v21, %v351_v17  ;;  %v2413_v24 = vpop.f32.mrb[14].mxu1 }
 0x29c   :  { %v2552_v25 = vadd.f32 %v2413_v24, %v354_v19  ;;  %v1108_v26 = vpop.f32.mrb[15].mxu1  ;;  %v1126_v29 = vmax.f32 %v2550_v20, 0.0  ;;  %v2676_v20 = vld [vmem:[#allocation5 + $0x48] sm:$0xff]  }
 0x29d   :  { %v1124_v27 = vmax.f32 %v2551_v23, 0.0  ;;  %v2553_v28 = vadd.f32 %v1108_v26, %v352_v22 }
 0x29e   :  { %v1127_v31 = vmax.f32 %v2552_v25, 0.0 }
 0x29f   :  { %v2143_v32 = vpack.c.bf16 %v1124_v27, %v1124_v27  ;;  %v1125_v35 = vmax.f32 %v2553_v28, 0.0 }
 0x2a0   :  { %v1129_v36 = vpack.c.bf16 %v1127_v31, %v1126_v29  ;;  %v2678_v31 = vld [vmem:[#allocation5 + $0x58] sm:$0xff]  }
 0x2a1   :  { %v2144_v40 = vpack.c.bf16 %v1125_v35, %v1125_v35  ;;  %v1603_v41 = vmul.bf16 %v2143_v32, %v1594_v30  ;;  %v1722_v42 = vmul.bf16 %v2143_v32, %v2121_v33  ;;  %v1128_v43 = vpack.c.bf16 %v1125_v35, %v1124_v27  ;;  %v2677_v27 = vld [vmem:[#allocation5 + $0x50] sm:$0xff]  }
 0x2a2   :  { %v1841_v44 = vmul.bf16 %v2143_v32, %v2132_v34 }
 0x2a3   :  { %v1604_v45 = vmul.bf16 %v2144_v40, %v1595_v37  ;;  %v1723_v47 = vmul.bf16 %v2144_v40, %v2122_v38  ;;  %v1842_v48 = vmul.bf16 %v2144_v40, %v2133_v39  ;;  %2415 = vmatpush3.bf16.msra.mxu0 %v1128_v43  ;;  %v2679_v38 = vld [vmem:[#allocation5 + $0x60] sm:$0xff]   ;;  %v2680_v40 = vld [vmem:[#allocation5 + $0x68] sm:$0xff]  }
 0x2a4   :  { %2416 = vmatprep.subr.bf16.mxu0 %v2871_v60  ;;  %v2683_v43 = vld [vmem:[#allocation5 + $0x80] sm:$0xff]  }
 0x2a5   :  { %v3141_v46 = vcombine.low %v1603_v41, %v1604_v45  ;;  %v3143_v49 = vcombine.low %v1722_v42, %v1723_v47  ;;  %v3145_v50 = vcombine.low %v1841_v44, %v1842_v48  ;;  %v2681_v41 = vld [vmem:[#allocation5 + $0x70] sm:$0xff]   ;;  %v2682_v42 = vld [vmem:[#allocation5 + $0x78] sm:$0xff]   ;;  %v2684_v44 = vld [vmem:[#allocation5 + $0x88] sm:$0xff]  }
 0x2a6   :  { %v2685_v45 = vld [vmem:[#allocation5 + $0x90] sm:$0xff]   ;;  %v2686_v47 = vld [vmem:[#allocation5 + $0x98] sm:$0xff]   ;;  %v2687_v48 = vld [vmem:[#allocation5 + $0xa0] sm:$0xff]  }
 0x2a7   :  { %2417 = vmatpush3.bf16.msra.mxu0 %v1129_v36 }
 0x2a8   :  { %2430 = vmatprep.subr.bf16.mxu0 %v2871_v60 }
 0x2aa   :  { %2419 = vmatmul.mubr.msk.bf16.vlgmr.msra.gmra.mrb[0].mxu0 %vm1142_vm2, %v1130_v61  ;;  %v1154_v61 = vpop.xlane.xlu1 %1153 }
 0x2ab   :  { %2422 = vmatprep.mubr.msk.bf16.mxu0 %vm2872_vm1, %v2871_v60  ;;  %2431 = vmatpush3.bf16.msra.mxu0 %v2667_v51  ;;  %v1164_v63 = vmax.f32 %v1154_v61, 1.0  ;;  %v2688_v51 = vld [vmem:[#allocation5 + $0xa8] sm:$0xff]   ;;  %v2701_v61 = vld [vmem:[#allocation5 + $0x110] sm:$0xff]  }
 0x2ac   :  { %2432 = vmatprep.subr.bf16.mxu0 %v2871_v60 }
 0x2ad   :  { %2754 = vrcp.f32 %v1164_v63  ;;  %v2703_v63 = vld [vmem:[#allocation5 + $0x120] sm:$0xff]  }
 0x2ae   :  { %2756 = vrcp.f32 %v1165_v9  ;;  %v2710_v9 = vld [vmem:[#allocation5 + $0x158] sm:$0xff]  }
 0x2af   :  { %2433 = vmatpush3.bf16.msra.mxu0 %v2668_v2  ;;  %v2689_v2 = vld [vmem:[#allocation5 + $0xb0] sm:$0xff]  }
 0x2b0   :  { %2434 = vmatprep.subr.bf16.mxu0 %v2871_v60 }
 0x2b2   :  { %2423 = vmatmul.mubr.msk.bf16.gmra.mrb[4].mxu0 %vm1142_vm2, %v1132_v6  ;;  %v1160_v6 = vpop.xlane.xlu1 %1159 }
 0x2b3   :  { %2426 = vmatprep.mubr.msk.bf16.mxu0 %vm2872_vm1, %v2871_v60  ;;  %2435 = vmatpush3.bf16.msra.mxu0 %v2669_v0  ;;  %v1166_v12 = vmax.f32 %v1160_v6, 1.0  ;;  %v2690_v0 = vld [vmem:[#allocation5 + $0xb8] sm:$0xff]   ;;  %v2707_v6 = vld [vmem:[#allocation5 + $0x140] sm:$0xff]  }
 0x2b4   :  { %2436 = vmatprep.subr.bf16.mxu0 %v2871_v60 }
 0x2b5   :  { %2758 = vrcp.f32 %v1166_v12  ;;  %v2714_v12 = vld [vmem:[#allocation5 + $0x178] sm:$0xff]  }
 0x2b7   :  { %2437 = vmatpush3.bf16.msra.mxu0 %v2670_v1  ;;  %v2691_v1 = vld [vmem:[#allocation5 + $0xc0] sm:$0xff]  }
 0x2b8   :  { %2438 = vmatprep.subr.bf16.mxu0 %v2871_v60 }
 0x2ba   :  { %2427 = vmatmul.mubr.msk.bf16.gmra.mrb[8].mxu0 %vm1142_vm2, %v3102_v7  ;;  %v2751_v7 = vpop.eup %2750 }
 0x2bb   :  { %2439 = vmatpush3.bf16.msra.mxu0 %v2671_v4  ;;  %2446 = vmatprep.mubr.msk.bf16.mxu0 %vm2872_vm1, %v2871_v60  ;;  %v2753_v18 = vpop.eup %2752  ;;  %v2692_v4 = vld [vmem:[#allocation5 + $0xc8] sm:$0xff]  }
 0x2bc   :  { %2440 = vmatprep.subr.bf16.mxu0 %v2871_v60  ;;  %v2755_v19 = vpop.eup %2754 }
 0x2bd   :  { %v2757_v29 = vpop.eup %2756 }
 0x2bf   :  { %2441 = vmatpush3.bf16.msra.mxu0 %v2672_v52  ;;  %v2759_v30 = vpop.eup %2758  ;;  %v2693_v52 = vld [vmem:[#allocation5 + $0xd0] sm:$0xff]  }
 0x2c0   :  { %2442 = vmatprep.subr.bf16.mxu0 %v2871_v60 }
 0x2c3   :  { %2443 = vmatpush3.bf16.msra.mxu0 %v2673_v53  ;;  %v2694_v53 = vld [vmem:[#allocation5 + $0xd8] sm:$0xff]  }
 0x2c4   :  { %2444 = vmatprep.subr.bf16.mxu0 %v2871_v60 }
 0x2c7   :  { %2445 = vmatpush3.bf16.msra.mxu0 %v2674_v54  ;;  %v2695_v54 = vld [vmem:[#allocation5 + $0xe0] sm:$0xff]  }
 0x2c8   :  { %2450 = vmatprep.subr.bf16.mxu0 %v2871_v60 }
 0x37d   :  { %v1237_v8 = vpop.f32.mrb[0].mxu0 }
 0x37e   :  { %v2420_v10 = vpop.f32.mrb[1].mxu0  ;;  %v1260_v13 = vmul.f32 %v2749_v5, %v1237_v8  ;;  %v2706_v5 = vld [vmem:[#allocation5 + $0x138] sm:$0xff]   ;;  %v2709_v8 = vld [vmem:[#allocation5 + $0x150] sm:$0xff]  }
 0x37f   :  { %v1240_v11 = vpop.f32.mrb[2].mxu0  ;;  %v2711_v10 = vld [vmem:[#allocation5 + $0x160] sm:$0xff]  }
 0x380   :  { %v1261_v14 = vmul.f32 %v2751_v7, %v1240_v11  ;;  %v2421_v15 = vpop.f32.mrb[3].mxu0  ;;  %v2708_v7 = vld [vmem:[#allocation5 + $0x148] sm:$0xff]   ;;  %v2713_v11 = vld [vmem:[#allocation5 + $0x170] sm:$0xff]  }
 0x381   :  { %v1269_v15 = vld [vmem:[#allocation7] sm:$0xff] }
 0x382   :  { %v1266_v17 = vpack.c.bf16 %v1261_v14, %v1260_v13  ;;  %v1957_v13 = vlaneseq }
 0x384   :  { %2447 = vmatmul.mubr.bf16.vlgmr.msra.gmra.mrb[12].mxu0 %v1266_v17  ;;  %v1958_v14 = vand.u32 127, %v1957_v13  ;;  %v1270_v17 = vld [vmem:[#allocation7 + $0x8] sm:$0xff] }
 0x385   :  { %2451 = vmatpush3.bf16.msra.mxu0 %v2675_v16  ;;  %v1245_v21 = vpop.f32.mrb[4].mxu0  ;;  %2466 = vmatprep.mubr.msk.bf16.mxu0 %vm2872_vm1, %v2871_v60 }
 0x386   :  { %2452 = vmatprep.subr.bf16.mxu0 %v2871_v60  ;;  %v1262_v22 = vmul.f32 %v2753_v18, %v1245_v21  ;;  %v2424_v23 = vpop.f32.mrb[5].mxu0  ;;  %vm1959_vm3 = vcmp.lt.s32.totalorder %v1958_v14, 16 }
 0x387   :  { %v1248_v24 = vpop.f32.mrb[6].mxu0 }
 0x388   :  { %v1263_v25 = vmul.f32 %v2755_v19, %v1248_v24  ;;  %v2425_v26 = vpop.f32.mrb[7].mxu0 }
 0x389   :  { %2453 = vmatpush3.bf16.msra.mxu0 %v2676_v20 }
 0x38a   :  { %2454 = vmatprep.subr.bf16.mxu0 %v2871_v60  ;;  %v1267_v28 = vpack.c.bf16 %v1263_v25, %v1262_v22 }
 0x38d   :  { %2455 = vmatpush3.bf16.msra.mxu0 %v2677_v27  ;;  %v1253_v32 = vpop.f32.mrb[8].mxu0 }
 0x38e   :  { %2456 = vmatprep.subr.bf16.mxu0 %v2871_v60  ;;  %v1264_v33 = vmul.f32 %v2757_v29, %v1253_v32  ;;  %v2428_v34 = vpop.f32.mrb[9].mxu0 }
 0x38f   :  { %v1256_v35 = vpop.f32.mrb[10].mxu0 }
 0x390   :  { %v1265_v36 = vmul.f32 %v2759_v30, %v1256_v35  ;;  %v2429_v37 = vpop.f32.mrb[11].mxu0 }
 0x391   :  { %2457 = vmatpush3.bf16.msra.mxu0 %v2678_v31 }
 0x392   :  { %2458 = vmatprep.subr.bf16.mxu0 %v2871_v60  ;;  %v1268_v39 = vpack.c.bf16 %v1265_v36, %v1264_v33 }
 0x395   :  { %2459 = vmatpush3.bf16.msra.mxu0 %v2679_v38 }
 0x396   :  { %2460 = vmatprep.subr.bf16.mxu0 %v2871_v60 }
 0x399   :  { %2461 = vmatpush3.bf16.msra.mxu0 %v2680_v40 }
 0x39a   :  { %2462 = vmatprep.subr.bf16.mxu0 %v2871_v60 }
 0x39d   :  { %2463 = vmatpush3.bf16.msra.mxu0 %v2681_v41 }
 0x39e   :  { %2464 = vmatprep.subr.bf16.mxu0 %v2871_v60 }
 0x3a1   :  { %2465 = vmatpush3.bf16.msra.mxu0 %v2682_v42 }
 0x3a2   :  { %2470 = vmatprep.subr.bf16.mxu0 %v2871_v60 }
 0x3a4   :  { %2467 = vmatmul.mubr.bf16.vlgmr.msra.gmra.mrb[12].mxu0 %v1267_v28 }
 0x3a5   :  { %2471 = vmatpush3.bf16.msra.mxu0 %v2683_v43  ;;  %2486 = vmatprep.mubr.msk.bf16.mxu0 %vm2872_vm1, %v2871_v60 }
 0x3a6   :  { %2472 = vmatprep.subr.bf16.mxu0 %v2871_v60 }
 0x3a9   :  { %2473 = vmatpush3.bf16.msra.mxu0 %v2684_v44 }
 0x3aa   :  { %2474 = vmatprep.subr.bf16.mxu0 %v2871_v60 }
 0x3ad   :  { %2475 = vmatpush3.bf16.msra.mxu0 %v2685_v45 }
 0x3ae   :  { %2476 = vmatprep.subr.bf16.mxu0 %v2871_v60 }
 0x3b1   :  { %2477 = vmatpush3.bf16.msra.mxu0 %v2686_v47 }
 0x3b2   :  { %2478 = vmatprep.subr.bf16.mxu0 %v2871_v60 }
 0x3b5   :  { %2479 = vmatpush3.bf16.msra.mxu0 %v2687_v48 }
 0x3b6   :  { %2480 = vmatprep.subr.bf16.mxu0 %v2871_v60 }
 0x3b9   :  { %2481 = vmatpush3.bf16.msra.mxu0 %v2688_v51 }
 0x3ba   :  { %2482 = vmatprep.subr.bf16.mxu0 %v2871_v60 }
 0x3bd   :  { %2483 = vmatpush3.bf16.msra.mxu0 %v2689_v2 }
 0x3be   :  { %2484 = vmatprep.subr.bf16.mxu0 %v2871_v60 }
 0x3c1   :  { %2485 = vmatpush3.bf16.msra.mxu0 %v2690_v0 }
 0x3c2   :  { %2490 = vmatprep.subr.bf16.mxu0 %v2871_v60 }
 0x3c4   :  { %2487 = vmatmul.mubr.bf16.vlgmr.msra.gmra.mrb[12].mxu0 %v1268_v39 }
 0x3c5   :  { %2491 = vmatpush3.bf16.msra.mxu0 %v2691_v1  ;;  %2506 = vmatprep.mubr.msk.bf16.mxu0 %vm2872_vm1, %v2871_v60 }
 0x3c6   :  { %2492 = vmatprep.subr.bf16.mxu0 %v2871_v60 }
 0x3c9   :  { %2493 = vmatpush3.bf16.msra.mxu0 %v2692_v4 }
 0x3ca   :  { %2494 = vmatprep.subr.bf16.mxu0 %v2871_v60 }
 0x3cd   :  { %2495 = vmatpush3.bf16.msra.mxu0 %v2693_v52 }
 0x3ce   :  { %2496 = vmatprep.subr.bf16.mxu0 %v2871_v60 }
 0x3d1   :  { %2497 = vmatpush3.bf16.msra.mxu0 %v2694_v53 }
 0x3d2   :  { %2498 = vmatprep.subr.bf16.mxu0 %v2871_v60 }
 0x3d5   :  { %2499 = vmatpush3.bf16.msra.mxu0 %v2695_v54 }
 0x3d6   :  { %2500 = vmatprep.subr.bf16.mxu0 %v2871_v60 }
 0x3d9   :  { %2501 = vmatpush3.bf16.msra.mxu0 %v2696_v55 }
 0x3da   :  { %2502 = vmatprep.subr.bf16.mxu0 %v2871_v60 }
 0x3dd   :  { %2503 = vmatpush3.bf16.msra.mxu0 %v2697_v56 }
 0x3de   :  { %2504 = vmatprep.subr.bf16.mxu0 %v2871_v60 }
 0x3e1   :  { %2505 = vmatpush3.bf16.msra.mxu0 %v2698_v57 }
 0x3e2   :  { %2510 = vmatprep.subr.bf16.mxu0 %v2871_v60 }
 0x3e4   :  { %2507 = vmatmul.mubr.bf16.vlgmr.msra.gmra.mrb[12].mxu0 %v3141_v46  ;;  %v2704_v46 = vld [vmem:[#allocation5 + $0x128] sm:$0xff]  }
 0x3e5   :  { %2511 = vmatpush3.bf16.msra.mxu0 %v2699_v58  ;;  %2526 = vmatprep.mubr.msk.bf16.mxu0 %vm2872_vm1, %v2871_v60 }
 0x3e6   :  { %2512 = vmatprep.subr.bf16.mxu0 %v2871_v60 }
 0x3e9   :  { %2513 = vmatpush3.bf16.msra.mxu0 %v2700_v59 }
 0x3ea   :  { %2514 = vmatprep.subr.bf16.mxu0 %v2871_v60 }
 0x3ed   :  { %2515 = vmatpush3.bf16.msra.mxu0 %v2701_v61 }
 0x3ee   :  { %2516 = vmatprep.subr.bf16.mxu0 %v2871_v60 }
 0x3f1   :  { %2517 = vmatpush3.bf16.msra.mxu0 %v2702_v62 }
 0x3f2   :  { %2518 = vmatprep.subr.bf16.mxu0 %v2871_v60 }
 0x3f5   :  { %2519 = vmatpush3.bf16.msra.mxu0 %v2703_v63 }
 0x3f6   :  { %2520 = vmatprep.subr.bf16.mxu0 %v2871_v60 }
 0x3f9   :  { %2521 = vmatpush3.bf16.msra.mxu0 %v2704_v46 }
 0x3fa   :  { %2522 = vmatprep.subr.bf16.mxu0 %v2871_v60 }
 0x3fd   :  { %2523 = vmatpush3.bf16.msra.mxu0 %v2705_v3 }
 0x3fe   :  { %2524 = vmatprep.subr.bf16.mxu0 %v2871_v60 }
 0x401   :  { %2525 = vmatpush3.bf16.msra.mxu0 %v2706_v5 }
 0x402   :  { %2530 = vmatprep.subr.bf16.mxu0 %v2871_v60 }
 0x404   :  { %2527 = vmatmul.mubr.bf16.vlgmr.msra.gmra.mrb[12].mxu0 %v3143_v49  ;;  %v2712_v49 = vld [vmem:[#allocation5 + $0x168] sm:$0xff]  }
 0x405   :  { %2531 = vmatpush3.bf16.msra.mxu0 %v2707_v6  ;;  %2546 = vmatprep.mubr.msk.bf16.mxu0 %vm2872_vm1, %v2871_v60 }
 0x406   :  { %2532 = vmatprep.subr.bf16.mxu0 %v2871_v60 }
 0x409   :  { %2533 = vmatpush3.bf16.msra.mxu0 %v2708_v7 }
 0x40a   :  { %2534 = vmatprep.subr.bf16.mxu0 %v2871_v60 }
 0x40d   :  { %2535 = vmatpush3.bf16.msra.mxu0 %v2709_v8 }
 0x40e   :  { %2536 = vmatprep.subr.bf16.mxu0 %v2871_v60 }
 0x411   :  { %2537 = vmatpush3.bf16.msra.mxu0 %v2710_v9 }
 0x412   :  { %2538 = vmatprep.subr.bf16.mxu0 %v2871_v60 }
 0x415   :  { %2539 = vmatpush3.bf16.msra.mxu0 %v2711_v10 }
 0x416   :  { %2540 = vmatprep.subr.bf16.mxu0 %v2871_v60 }
 0x419   :  { %2541 = vmatpush3.bf16.msra.mxu0 %v2712_v49 }
 0x41a   :  { %2542 = vmatprep.subr.bf16.mxu0 %v2871_v60 }
 0x41d   :  { %2543 = vmatpush3.bf16.msra.mxu0 %v2713_v11 }
 0x41e   :  { %2544 = vmatprep.subr.bf16.mxu0 %v2871_v60 }
 0x421   :  { %2545 = vmatpush3.bf16.msra.mxu0 %v2714_v12 }
 0x424   :  { %2547 = vmatmul.mubr.bf16.vlgmr.msra.gmra.mrb[12].mxu0 %v3145_v50 }
 0x4f7   :  { %v1948_v16 = vpop.f32.mrb[12].mxu0 }
 0x4f8   :  { %v2554_v18 = vadd.f32 %v1948_v16, %v1269_v15  ;;  %v2548_v19 = vpop.f32.mrb[13].mxu0 }
 0x4f9   :  { %v1951_v20 = vpop.f32.mrb[14].mxu0 }
 0x4fa   :  { %v2555_v21 = vadd.f32 %v1951_v20, %v1270_v17  ;;  %v2549_v22 = vpop.f32.mrb[15].mxu0  ;;  %v1960_v23 = vsel %vm1959_vm3, %v2554_v18, -1e+30 }
 0x4fb   :  { %1962 = vmax.xlane.f32.xlu0 %v1960_v23 }
 0x4fc   :  { %v1961_v24 = vsel %vm1959_vm3, %v2555_v21, -1e+30 }
 0x4fd   :  { %1964 = vmax.xlane.f32.xlu1 %v1961_v24 }
 0x588   :  { %v1963_v25 = vpop.xlane.xlu0 %1962 }
 0x589   :  { %v1966_v60 = vsub.f32 %v1960_v23, %v1963_v25 }
 0x58a   :  { %v1965_v26 = vpop.xlane.xlu1 %1964 }
 0x58b   :  { %v1968_v27 = vmul.f32 1.442695, %v1966_v60  ;;  %v1967_v50 = vsub.f32 %v1961_v24, %v1965_v26 }
 0x58d   :  { %2760 = vpow2.f32 %v1968_v27  ;;  %v1970_v28 = vmul.f32 1.442695, %v1967_v50 }
 0x58f   :  { %2762 = vpow2.f32 %v1970_v28 }
 0x597   :  { %v2761_v29 = vpop.eup %2760 }
 0x598   :  { %1972 = vadd.xlane.f32.xlu0 %v2761_v29 }
 0x599   :  { %v2763_v30 = vpop.eup %2762 }
 0x59a   :  { %1974 = vadd.xlane.f32.xlu1 %v2763_v30 }
 0x625   :  { %v1973_v31 = vpop.xlane.xlu0 %1972 }
 0x626   :  { %2764 = vlog2.f32 %v1973_v31 }
 0x627   :  { %v1975_v32 = vpop.xlane.xlu1 %1974 }
 0x628   :  { %2766 = vlog2.f32 %v1975_v32 }
 0x630   :  { %v2765_v33 = vpop.eup %2764 }
 0x631   :  { %v1977_v34 = vmul.f32 0.6931472, %v2765_v33 }
 0x632   :  { %v2767_v35 = vpop.eup %2766 }
 0x633   :  { %v1980_v36 = vsub.f32 %v1966_v60, %v1977_v34  ;;  %v1979_v37 = vmul.f32 0.6931472, %v2767_v35 }
 0x635   :  { %1982 = vst [vmem:[#allocation8] sm:$0xff] %v1980_v36  ;;  %v1981_v38 = vsub.f32 %v1967_v50, %v1979_v37 }
 0x637   :  { %1983 = vst [vmem:[#allocation8 + $0x8] sm:$0xff] %v1981_v38 }
 0x638   :  { %2847 = shalt.err (!%p2844_p0)
}
 0x639   :  { %s2848_s13 = scalar_lea.hbm %s3242_s9, 256 }
 0x63a   :  { %p2849_p1 = scmp.ne.s32.totalorder %s3242_s9, %s2848_s13  ;;  %p2852_p2 = scmp.lt.u32.totalorder %s2848_s13, %s3242_s9 }
 0x63c   :  { %p2854_p3 = pnand %p2852_p2, %p2849_p1 }
 0x63e   :  { %2857 = shalt.err (!%p2854_p3)
}
 0x63f   :  { %1995 = dma.vmem_to_hbm [thread:$0]  %s1990_s11, 256, %s3242_s9, [#allocation4], %s2869_s2, %s2869_s2, %s2870_s12  }
 0x640   :  { %2862 = dma.done.wait [#allocation4], 256  }
 0x641   :  { %2863 = vsyncadd [#allocation4], 4294967040 }
 0x642   :  { %1999 = vsyncpa [#allocation3], 1 }
 0x643   :  { %2000 = vsyncpa [#allocation6], 1 }
 0x644   :  { %2001 = vsyncpa [#allocation4], 1 }

</bundles_post_ra>
